<compile_context>
chip_gen: v6e
topology: v6e:2x2x1
jax: 0.10.0
libtpu: 0.0.40
codegen_flags: <defaults>
</compile_context>

<pallas_src>
import jax
import jax.numpy as jnp
from jax import lax
from jax.experimental import pallas as pl
from jax.experimental.pallas import tpu as pltpu

NEG_SLOPE = 0.01  # nn.LeakyReLU default
BF16 = jnp.bfloat16


def _leaky_relu(x):
    return jnp.where(x > 0, x, NEG_SLOPE * x)


def _round_up(n, m):
    return ((n + m - 1) // m) * m


# ----------------------------------------------------------------------------
# Fused kernel (one batch tile): dual-path LSTM encoder + MLP match head.
#
#   encode_*_path:  p -> embedding -> c = ReLU(Linear(p[:,0,:]))
#                   X = LSTM(pack_padded(p, lens)); pad back with zeros
#                   out = max_t (c * X_t)
#   match: MLP over cat([hu, hpu, hv, hpv, qf])
# ----------------------------------------------------------------------------
def fused_forward_kernel(
        p_ref,        # (L, TB, 2D) bf16  time-major [emb(pu) | emb(pv)]
        xrq_ref,      # (TB, 3D)    bf16  [hu | hv | qf]
        lens_ref,     # (TB, 2H)    int32 [len_u x H | len_v x H]
        hc0_ref,      # (TB, 4H)    f32   [h0_p | h0_c | c0_p | c0_c]
        tmax_ref,     # (1, 2H)     int32 global max(lens) per path
        wihwc_ref,    # (2D, 10H)   bf16  [W_ih gate block (8H) | W_ctrl (2H)]
        whh_ref,      # (2H, 8H)    bf16  block-diag recurrent weights
        blstm_ref,    # (1, 8H)     f32   b_ih + b_hh, gate-interleaved
        w1x_ref,      # (3D, H1P)   bf16
        w1p_ref,      # (2H, H1P)   bf16
        b1_ref,       # (1, H1P)    f32
        w2_ref,       # (H1P, H2P)  bf16
        b2_ref,       # (1, H2P)    f32
        w3_ref,       # (1, H2P)    bf16
        b3_ref,       # (1, 1)      f32
        out_ref):     # (1, TB)     f32   lane-dense scores

    L = p_ref.shape[0]
    TB, HH = lens_ref.shape                 # HH = 2H  (parent | child lanes)
    G = 4 * HH                              # 8H gate block width

    wihwc = wihwc_ref[...]
    wih = wihwc[:, :G]                      # (2D, 8H)
    wc = wihwc[:, G:]                       # (2D, 2H) block-diag control weight
    whh = whh_ref[...]                      # (2H, 8H)
    blstm = blstm_ref[...]                  # (1, 8H)

    # Control vectors for both paths in one push: ReLU(Linear(p[:, 0, :])).
    ctrl = jnp.maximum(
        jnp.dot(p_ref[0], wc, preferred_element_type=jnp.float32), 0.0)

    lens_rep = lens_ref[...]                # (TB, 2H) int32
    hc0 = hc0_ref[...]
    h = hc0[:, :HH]                         # (TB, 2H) f32  [h_p | h_c]
    c = hc0[:, HH:]
    m = jnp.full((TB, HH), -jnp.inf, dtype=jnp.float32)

    # Fused recurrence: one MXU push (K=2H, N=8H) + one sigmoid + one tanh
    # EUP push per timestep serve both the parent and the child path.
    for t in range(L):
        gates = (jnp.dot(p_ref[t], wih, preferred_element_type=jnp.float32)
                 + jnp.dot(h.astype(BF16), whh,
                           preferred_element_type=jnp.float32)
                 + blstm)                    # (TB, 8H) f32
        sig = jax.nn.sigmoid(gates)
        tnh = jnp.tanh(gates)
        # Gate-interleaved lane layout -> static contiguous slices, no shuffle.
        i_g = sig[:, 0 * HH:1 * HH]
        f_g = sig[:, 1 * HH:2 * HH]
        g_g = tnh[:, 2 * HH:3 * HH]
        o_g = sig[:, 3 * HH:4 * HH]
        c_new = f_g * c + i_g * g_g
        h_new = o_g * jnp.tanh(c_new)

        valid = t < lens_rep                 # pack_padded mask, per path
        h = jnp.where(valid, h_new, h)
        c = jnp.where(valid, c_new, c)
        m = jnp.maximum(m, jnp.where(valid, ctrl * h_new, -jnp.inf))

    # pad_packed_sequence: rows with lens[b] < max(lens) see zero-padded
    # timesteps, and those zeros participate in the max over time.
    tmax = tmax_ref[...]
    m = jnp.where(lens_rep < tmax, jnp.maximum(m, 0.0), m)
    # Guard the out-of-contract lens==0 case (padded batch rows).
    hp = jnp.where(lens_rep > 0, m, 0.0)     # (TB, 2H) = [hpu | hpv]

    # MLP match head over cat([hu, hpu, hv, hpv, qf]); W1 pre-split into the
    # raw-embedding slab [hu|hv|qf] and the path slab [hpu|hpv].
    h1 = (jnp.dot(xrq_ref[...], w1x_ref[...],
                  preferred_element_type=jnp.float32)
          + jnp.dot(hp.astype(BF16), w1p_ref[...],
                    preferred_element_type=jnp.float32)
          + b1_ref[...])
    h1 = _leaky_relu(h1)
    h2 = _leaky_relu(
        jnp.dot(h1.astype(BF16), w2_ref[...],
                preferred_element_type=jnp.float32) + b2_ref[...])
    # Lane-dense scores: (1, TB) with batch on the lane axis.
    scores = lax.dot_general(
        w3_ref[...], h2.astype(BF16),
        (((1,), (1,)), ((), ())),
        preferred_element_type=jnp.float32) + b3_ref[...]
    out_ref[...] = scores


# ----------------------------------------------------------------------------
# MatchModel (mode='rp', matching_method='MLP')
# ----------------------------------------------------------------------------
class MatchModelPallas:
    def __init__(self, key, vocab, in_dim, out_dim, k=2, match_hidden=100):
        self.in_dim, self.out_dim = in_dim, out_dim
        D, H = in_dim, out_dim
        self.l_dim = in_dim + out_dim          # 'r' + 'p'
        self.r_dim = in_dim
        H1, H2 = k * match_hidden, match_hidden
        H1P, H2P = _round_up(H1, 128), _round_up(H2, 128)   # 200->256, 100->128
        self.H1P, self.H2P = H1P, H2P

        ks = jax.random.split(key, 16)
        u = lambda kk, shape, s: jax.random.uniform(kk, shape, jnp.float32, -s, s)
        s_lstm = 1.0 / (H ** 0.5)
        s_ctrl = 1.0 / (D ** 0.5)

        # Raw parameters in PyTorch layout.
        emb = jax.random.normal(ks[0], (vocab, D), jnp.float32)
        p_w_ih = u(ks[1], (4 * H, D), s_lstm)
        p_w_hh = u(ks[2], (4 * H, H), s_lstm)
        p_b_ih = u(ks[3], (4 * H,), s_lstm)
        p_b_hh = u(ks[4], (4 * H,), s_lstm)
        p_ctrl = u(ks[5], (H, D), s_ctrl)
        c_w_ih = u(ks[6], (4 * H, D), s_lstm)
        c_w_hh = u(ks[7], (4 * H, H), s_lstm)
        c_b_ih = u(ks[8], (4 * H,), s_lstm)
        c_b_hh = u(ks[9], (4 * H,), s_lstm)
        c_ctrl = u(ks[10], (H, D), s_ctrl)
        W1 = u(ks[11], (H1, 2 * self.l_dim + self.r_dim), 0.1)
        b1 = u(ks[12], (H1,), 0.1)
        W2 = u(ks[13], (H2, H1), 0.1)
        b2 = u(ks[14], (H2,), 0.1)
        W3 = u(ks[15], (1, H2), 0.1)
        b3 = jnp.zeros((1,), jnp.float32)

        # ---- Fused LSTM weights (built ONCE; nothing per-forward) ----------
        # state lane layout: [parent (H) | child (H)]
        # gate-block lane layout (8H): [i_p,i_c,f_p,f_c,g_p,g_c,o_p,o_c]
        wih_p_t, wih_c_t = jnp.transpose(p_w_ih), jnp.transpose(c_w_ih)  # (D,4H)
        whh_p_t, whh_c_t = jnp.transpose(p_w_hh), jnp.transpose(c_w_hh)  # (H,4H)
        b_p = p_b_ih + p_b_hh
        b_c = c_b_ih + c_b_hh

        wih_cat = jnp.zeros((2 * D, 8 * H), jnp.float32)
        whh_cat = jnp.zeros((2 * H, 8 * H), jnp.float32)
        blstm = jnp.zeros((1, 8 * H), jnp.float32)
        for g in range(4):                               # PyTorch order i,f,g,o
            cp = slice((2 * g) * H, (2 * g + 1) * H)     # parent gate columns
            cc = slice((2 * g + 1) * H, (2 * g + 2) * H) # child gate columns
            src = slice(g * H, (g + 1) * H)
            wih_cat = wih_cat.at[:D, cp].set(wih_p_t[:, src])
            wih_cat = wih_cat.at[D:, cc].set(wih_c_t[:, src])
            whh_cat = whh_cat.at[:H, cp].set(whh_p_t[:, src])
            whh_cat = whh_cat.at[H:, cc].set(whh_c_t[:, src])
            blstm = blstm.at[0, cp].set(b_p[src])
            blstm = blstm.at[0, cc].set(b_c[src])

        wc_cat = jnp.zeros((2 * D, 2 * H), jnp.float32)     # block-diag control
        wc_cat = wc_cat.at[:D, :H].set(jnp.transpose(p_ctrl))
        wc_cat = wc_cat.at[D:, H:].set(jnp.transpose(c_ctrl))

        # ---- MLP matcher: W1 rows follow cat([hu, hpu, hv, hpv, qf]) -------
        W1t = jnp.transpose(W1)                              # (3D + 2H, H1)
        o0, o1, o2, o3, o4, o5 = (0, D, D + H, 2 * D + H,
                                  2 * D + 2 * H, 3 * D + 2 * H)
        w1_xrq = jnp.zeros((3 * D, H1P), jnp.float32).at[:, :H1].set(
            jnp.concatenate([W1t[o0:o1], W1t[o2:o3], W1t[o4:o5]], axis=0))
        w1_pp = jnp.zeros((2 * H, H1P), jnp.float32).at[:, :H1].set(
            jnp.concatenate([W1t[o1:o2], W1t[o3:o4]], axis=0))
        w2_t = jnp.zeros((H1P, H2P), jnp.float32).at[:H1, :H2].set(
            jnp.transpose(W2))
        b1p = jnp.zeros((1, H1P), jnp.float32).at[0, :H1].set(b1)
        b2p = jnp.zeros((1, H2P), jnp.float32).at[0, :H2].set(b2)
        w3p = jnp.zeros((1, H2P), jnp.float32).at[0, :H2].set(W3[0])

        self.params = {
            # bf16 embedding: small precision deviation vs the f32 PyTorch
            # reference; all matmul accumulation stays f32 (v5e-safe).
            "embedding": emb.astype(BF16),
            "wih_wc": jnp.concatenate([wih_cat, wc_cat], axis=1).astype(BF16),
            "whh": whh_cat.astype(BF16),
            "blstm": blstm,
            "w1_xrq": w1_xrq.astype(BF16),
            "w1_pp": w1_pp.astype(BF16),
            "b1": b1p,
            "w2_t": w2_t.astype(BF16),
            "b2": b2p,
            "w3": w3p.astype(BF16),
            "b3": b3.reshape(1, 1),
        }

    def forward(self, q, u, v, pu, pv, lens, hidden_key):
        P = self.params
        emb = P["embedding"]
        B, L = pu.shape
        D, H = self.in_dim, self.out_dim
        H1P, H2P = self.H1P, self.H2P

        # Batch tile: 128 rows at realistic candidate counts (MXU-friendly,
        # unmasked vst of the (1, TB) scores); rounded-up B for tiny demos.
        TB = 128 if B >= 128 else _round_up(B, 8)
        nb = pl.cdiv(B, TB)
        B_pad = nb * TB
        pad = B_pad - B

        qf = jnp.take(emb, q, axis=0)                        # (B, D) bf16
        hu = jnp.take(emb, u, axis=0)
        hv = jnp.take(emb, v, axis=0)
        xrq = jnp.concatenate([hu, hv, qf], axis=-1)         # (B, 3D)

        # Time-major path embeddings, lane-concat parent|child -> (L, B, 2D).
        p_cat = jnp.concatenate(
            [jnp.take(emb, jnp.transpose(pu), axis=0),
             jnp.take(emb, jnp.transpose(pv), axis=0)], axis=-1)

        lens_i = lens.astype(jnp.int32)                      # (B, 2)
        # Global (whole-batch) max lens per path: pad_packed pads to this.
        tmax_rep = jnp.concatenate(
            [jnp.full((1, H), jnp.max(lens_i[:, 0]), jnp.int32),
             jnp.full((1, H), jnp.max(lens_i[:, 1]), jnp.int32)], axis=1)
        lens_rep = jnp.repeat(lens_i, H, axis=1)             # (B, 2H)

        # init_hidden: torch.randn each call -> deterministic randn here.
        h0p, c0p, h0c, c0c = [
            jax.random.normal(kk, (B, H), jnp.float32)
            for kk in jax.random.split(hidden_key, 4)]
        hc0 = jnp.concatenate([h0p, h0c, c0p, c0c], axis=-1)  # (B, 4H)

        # Pad the batch to a tile multiple (padded rows: lens=0 -> hp=0).
        xrq = jnp.pad(xrq, ((0, pad), (0, 0)))
        lens_rep = jnp.pad(lens_rep, ((0, pad), (0, 0)))
        hc0 = jnp.pad(hc0, ((0, pad), (0, 0)))
        p_cat = jnp.pad(p_cat, ((0, 0), (0, pad), (0, 0)))

        batch_spec = lambda w: pl.BlockSpec((TB, w), lambda i: (i, 0))
        const_spec = lambda r, cdim: pl.BlockSpec((r, cdim), lambda i: (0, 0))

        scores_t = pl.pallas_call(
            fused_forward_kernel,
            out_shape=jax.ShapeDtypeStruct((1, B_pad), jnp.float32),
            grid_spec=pltpu.PrefetchScalarGridSpec(
                num_scalar_prefetch=0,
                grid=(nb,),
                in_specs=[
                    pl.BlockSpec((L, TB, 2 * D), lambda i: (0, i, 0)),  # p_cat
                    batch_spec(3 * D),                                  # xrq
                    batch_spec(2 * H),                                  # lens_rep
                    batch_spec(4 * H),                                  # hc0
                    const_spec(1, 2 * H),                               # tmax
                    const_spec(2 * D, 10 * H),                          # wih|wc
                    const_spec(2 * H, 8 * H),                           # whh
                    const_spec(1, 8 * H),                               # lstm bias
                    const_spec(3 * D, H1P),                             # w1_xrq
                    const_spec(2 * H, H1P),                             # w1_pp
                    const_spec(1, H1P),                                 # b1
                    const_spec(H1P, H2P),                               # w2
                    const_spec(1, H2P),                                 # b2
                    const_spec(1, H2P),                                 # w3
                    const_spec(1, 1),                                   # b3
                ],
                out_specs=pl.BlockSpec((1, TB), lambda i: (0, i)),
            ),
            compiler_params=pltpu.CompilerParams(
                dimension_semantics=("parallel",)),     # v7x: 2 TCs split tiles
        )(p_cat, xrq, lens_rep, hc0, tmax_rep,
          P["wih_wc"], P["whh"], P["blstm"],
          P["w1_xrq"], P["w1_pp"], P["b1"], P["w2_t"], P["b2"],
          P["w3"], P["b3"])

        return jnp.transpose(scores_t)[:B]               # (B, 1)


if __name__ == "__main__":
    B, L, VOCAB = 8, 8, 50
    IN_DIM, OUT_DIM = 32, 32

    key = jax.random.PRNGKey(0)
    k_model, k_q, k_u, k_v, k_pu, k_pv, k_len, k_hid = jax.random.split(key, 8)

    model = MatchModelPallas(k_model, VOCAB, IN_DIM, OUT_DIM, k=2,
                             match_hidden=100)

    q = jax.random.randint(k_q, (B,), 0, VOCAB)
    u = jax.random.randint(k_u, (B,), 0, VOCAB)
    v = jax.random.randint(k_v, (B,), 0, VOCAB)
    pu = jax.random.randint(k_pu, (B, L), 0, VOCAB)
    pv = jax.random.randint(k_pv, (B, L), 0, VOCAB)
    lens = jax.random.randint(k_len, (B, 2), 1, L + 1)   # valid lengths [1, L]

    scores = model.forward(q, u, v, pu, pv, lens, k_hid)
    jax.block_until_ready(scores)
    assert scores.shape == (B, 1) and scores.dtype == jnp.float32
    assert bool(jnp.all(jnp.isfinite(scores)))
    print("KERNEL_OK")
</pallas_src>

<mosaic_0001>
module attributes {stable_mosaic.version = 11 : i64} {
  func.func @fused_forward_kernel(%arg0: i32, %arg1: memref<8x8x64xbf16, #tpu.memory_space<vmem>>, %arg2: memref<8x96xbf16, #tpu.memory_space<vmem>>, %arg3: memref<8x64xi32, #tpu.memory_space<vmem>>, %arg4: memref<8x128xf32, #tpu.memory_space<vmem>>, %arg5: memref<1x64xi32, #tpu.memory_space<vmem>>, %arg6: memref<64x320xbf16, #tpu.memory_space<vmem>>, %arg7: memref<64x256xbf16, #tpu.memory_space<vmem>>, %arg8: memref<1x256xf32, #tpu.memory_space<vmem>>, %arg9: memref<96x256xbf16, #tpu.memory_space<vmem>>, %arg10: memref<64x256xbf16, #tpu.memory_space<vmem>>, %arg11: memref<1x256xf32, #tpu.memory_space<vmem>>, %arg12: memref<256x128xbf16, #tpu.memory_space<vmem>>, %arg13: memref<1x128xf32, #tpu.memory_space<vmem>>, %arg14: memref<1x128xbf16, #tpu.memory_space<vmem>>, %arg15: memref<1x1xf32, #tpu.memory_space<vmem>>, %arg16: memref<1x8xf32, #tpu.memory_space<vmem>>) attributes {dimension_semantics = [#tpu.dimension_semantics<parallel>], iteration_bounds = array<i64: 1>, scalar_prefetch = 0 : i64, scratch_operands = 0 : i64, tpu.core_type = #tpu.core_type<tc>, window_params = [{transform_indices = @transform_0, window_bounds = array<i64: 8, 8, 64>}, {transform_indices = @transform_1, window_bounds = array<i64: 8, 96>}, {transform_indices = @transform_2, window_bounds = array<i64: 8, 64>}, {transform_indices = @transform_3, window_bounds = array<i64: 8, 128>}, {pipeline_mode = #tpu.pipeline_mode<synchronous>, transform_indices = @transform_4, window_bounds = array<i64: 1, 64>}, {pipeline_mode = #tpu.pipeline_mode<synchronous>, transform_indices = @transform_5, window_bounds = array<i64: 64, 320>}, {pipeline_mode = #tpu.pipeline_mode<synchronous>, transform_indices = @transform_6, window_bounds = array<i64: 64, 256>}, {pipeline_mode = #tpu.pipeline_mode<synchronous>, transform_indices = @transform_7, window_bounds = array<i64: 1, 256>}, {pipeline_mode = #tpu.pipeline_mode<synchronous>, transform_indices = @transform_8, window_bounds = array<i64: 96, 256>}, {pipeline_mode = #tpu.pipeline_mode<synchronous>, transform_indices = @transform_9, window_bounds = array<i64: 64, 256>}, {pipeline_mode = #tpu.pipeline_mode<synchronous>, transform_indices = @transform_10, window_bounds = array<i64: 1, 256>}, {pipeline_mode = #tpu.pipeline_mode<synchronous>, transform_indices = @transform_11, window_bounds = array<i64: 256, 128>}, {pipeline_mode = #tpu.pipeline_mode<synchronous>, transform_indices = @transform_12, window_bounds = array<i64: 1, 128>}, {pipeline_mode = #tpu.pipeline_mode<synchronous>, transform_indices = @transform_13, window_bounds = array<i64: 1, 128>}, {pipeline_mode = #tpu.pipeline_mode<synchronous>, transform_indices = @transform_14, window_bounds = array<i64: 1, 1>}, {transform_indices = @transform_15, window_bounds = array<i64: 1, 8>}]} {
    %c0 = arith.constant 0 : index
    %c0_0 = arith.constant 0 : index
    %0 = vector.load %arg6[%c0, %c0_0] : memref<64x320xbf16, #tpu.memory_space<vmem>>, vector<64x320xbf16>
    %1 = vector.extract_strided_slice %0 {offsets = [0, 0], sizes = [64, 256], strides = [1, 1]} : vector<64x320xbf16> to vector<64x256xbf16>
    %2 = vector.extract_strided_slice %0 {offsets = [0, 256], sizes = [64, 64], strides = [1, 1]} : vector<64x320xbf16> to vector<64x64xbf16>
    %c0_1 = arith.constant 0 : index
    %c0_2 = arith.constant 0 : index
    %3 = vector.load %arg7[%c0_1, %c0_2] : memref<64x256xbf16, #tpu.memory_space<vmem>>, vector<64x256xbf16>
    %c0_3 = arith.constant 0 : index
    %c0_4 = arith.constant 0 : index
    %4 = vector.load %arg8[%c0_3, %c0_4] : memref<1x256xf32, #tpu.memory_space<vmem>>, vector<1x256xf32>
    %c0_5 = arith.constant 0 : index
    %c0_6 = arith.constant 0 : index
    %c0_7 = arith.constant 0 : index
    %5 = vector.load %arg1[%c0_5, %c0_6, %c0_7] : memref<8x8x64xbf16, #tpu.memory_space<vmem>>, vector<1x8x64xbf16>
    %6 = vector.shape_cast %5 : vector<1x8x64xbf16> to vector<8x64xbf16>
    %cst = arith.constant dense<0.000000e+00> : vector<8x64xf32>
    %7 = tpu.matmul %6, %2, %cst {dimension_numbers = #tpu.dot_dimension_numbers<[1], [0], [0], [1], [0, 0, 1, 1], [], []>} : vector<8x64xbf16>, vector<64x64xbf16>, vector<8x64xf32> -> vector<8x64xf32>
    %cst_8 = arith.constant 0.000000e+00 : f32
    %8 = vector.broadcast %cst_8 : f32 to vector<8x64xf32>
    %9 = arith.maximumf %7, %8 : vector<8x64xf32>
    %c0_9 = arith.constant 0 : index
    %c0_10 = arith.constant 0 : index
    %10 = vector.load %arg3[%c0_9, %c0_10] : memref<8x64xi32, #tpu.memory_space<vmem>>, vector<8x64xi32>
    %c0_11 = arith.constant 0 : index
    %c0_12 = arith.constant 0 : index
    %11 = vector.load %arg4[%c0_11, %c0_12] : memref<8x128xf32, #tpu.memory_space<vmem>>, vector<8x128xf32>
    %12 = vector.extract_strided_slice %11 {offsets = [0, 0], sizes = [8, 64], strides = [1, 1]} : vector<8x128xf32> to vector<8x64xf32>
    %13 = vector.extract_strided_slice %11 {offsets = [0, 64], sizes = [8, 64], strides = [1, 1]} : vector<8x128xf32> to vector<8x64xf32>
    %cst_13 = arith.constant 0xFF800000 : f32
    %14 = vector.broadcast %cst_13 : f32 to vector<8x64xf32>
    %c0_14 = arith.constant 0 : index
    %c0_15 = arith.constant 0 : index
    %c0_16 = arith.constant 0 : index
    %15 = vector.load %arg1[%c0_14, %c0_15, %c0_16] : memref<8x8x64xbf16, #tpu.memory_space<vmem>>, vector<1x8x64xbf16>
    %16 = vector.shape_cast %15 : vector<1x8x64xbf16> to vector<8x64xbf16>
    %cst_17 = arith.constant dense<0.000000e+00> : vector<8x256xf32>
    %17 = tpu.matmul %16, %1, %cst_17 {dimension_numbers = #tpu.dot_dimension_numbers<[1], [0], [0], [1], [0, 0, 1, 1], [], []>} : vector<8x64xbf16>, vector<64x256xbf16>, vector<8x256xf32> -> vector<8x256xf32>
    %18 = arith.truncf %12 : vector<8x64xf32> to vector<8x64xbf16>
    %cst_18 = arith.constant dense<0.000000e+00> : vector<8x256xf32>
    %19 = tpu.matmul %18, %3, %cst_18 {dimension_numbers = #tpu.dot_dimension_numbers<[1], [0], [0], [1], [0, 0, 1, 1], [], []>} : vector<8x64xbf16>, vector<64x256xbf16>, vector<8x256xf32> -> vector<8x256xf32>
    %20 = arith.addf %17, %19 : vector<8x256xf32>
    %21 = vector.broadcast %4 : vector<1x256xf32> to vector<8x256xf32>
    %22 = arith.addf %20, %21 : vector<8x256xf32>
    %23 = arith.negf %22 : vector<8x256xf32>
    %24 = math.exp %23 : vector<8x256xf32>
    %cst_19 = arith.constant 1.000000e+00 : f32
    %25 = vector.broadcast %cst_19 : f32 to vector<8x256xf32>
    %26 = arith.addf %25, %24 : vector<8x256xf32>
    %27 = arith.divf %25, %26 : vector<8x256xf32>
    %28 = math.tanh %22 : vector<8x256xf32>
    %29 = vector.extract_strided_slice %27 {offsets = [0, 0], sizes = [8, 64], strides = [1, 1]} : vector<8x256xf32> to vector<8x64xf32>
    %30 = vector.extract_strided_slice %27 {offsets = [0, 64], sizes = [8, 64], strides = [1, 1]} : vector<8x256xf32> to vector<8x64xf32>
    %31 = vector.extract_strided_slice %28 {offsets = [0, 128], sizes = [8, 64], strides = [1, 1]} : vector<8x256xf32> to vector<8x64xf32>
    %32 = vector.extract_strided_slice %27 {offsets = [0, 192], sizes = [8, 64], strides = [1, 1]} : vector<8x256xf32> to vector<8x64xf32>
    %33 = arith.mulf %30, %13 : vector<8x64xf32>
    %34 = arith.mulf %29, %31 : vector<8x64xf32>
    %35 = arith.addf %33, %34 : vector<8x64xf32>
    %36 = math.tanh %35 : vector<8x64xf32>
    %37 = arith.mulf %32, %36 : vector<8x64xf32>
    %c0_i32 = arith.constant 0 : i32
    %38 = vector.broadcast %c0_i32 : i32 to vector<8x64xi32>
    %39 = arith.cmpi sgt, %10, %38 : vector<8x64xi32>
    %40 = arith.select %39, %37, %12 : vector<8x64xi1>, vector<8x64xf32>
    %41 = arith.select %39, %35, %13 : vector<8x64xi1>, vector<8x64xf32>
    %42 = arith.mulf %9, %37 : vector<8x64xf32>
    %cst_20 = arith.constant 0xFF800000 : f32
    %43 = vector.broadcast %cst_20 : f32 to vector<8x64xf32>
    %44 = arith.select %39, %42, %43 : vector<8x64xi1>, vector<8x64xf32>
    %45 = arith.maximumf %14, %44 : vector<8x64xf32>
    %c1 = arith.constant 1 : index
    %c0_21 = arith.constant 0 : index
    %c0_22 = arith.constant 0 : index
    %46 = vector.load %arg1[%c1, %c0_21, %c0_22] : memref<8x8x64xbf16, #tpu.memory_space<vmem>>, vector<1x8x64xbf16>
    %47 = vector.shape_cast %46 : vector<1x8x64xbf16> to vector<8x64xbf16>
    %cst_23 = arith.constant dense<0.000000e+00> : vector<8x256xf32>
    %48 = tpu.matmul %47, %1, %cst_23 {dimension_numbers = #tpu.dot_dimension_numbers<[1], [0], [0], [1], [0, 0, 1, 1], [], []>} : vector<8x64xbf16>, vector<64x256xbf16>, vector<8x256xf32> -> vector<8x256xf32>
    %49 = arith.truncf %40 : vector<8x64xf32> to vector<8x64xbf16>
    %cst_24 = arith.constant dense<0.000000e+00> : vector<8x256xf32>
    %50 = tpu.matmul %49, %3, %cst_24 {dimension_numbers = #tpu.dot_dimension_numbers<[1], [0], [0], [1], [0, 0, 1, 1], [], []>} : vector<8x64xbf16>, vector<64x256xbf16>, vector<8x256xf32> -> vector<8x256xf32>
    %51 = arith.addf %48, %50 : vector<8x256xf32>
    %52 = vector.broadcast %4 : vector<1x256xf32> to vector<8x256xf32>
    %53 = arith.addf %51, %52 : vector<8x256xf32>
    %54 = arith.negf %53 : vector<8x256xf32>
    %55 = math.exp %54 : vector<8x256xf32>
    %cst_25 = arith.constant 1.000000e+00 : f32
    %56 = vector.broadcast %cst_25 : f32 to vector<8x256xf32>
    %57 = arith.addf %56, %55 : vector<8x256xf32>
    %58 = arith.divf %56, %57 : vector<8x256xf32>
    %59 = math.tanh %53 : vector<8x256xf32>
    %60 = vector.extract_strided_slice %58 {offsets = [0, 0], sizes = [8, 64], strides = [1, 1]} : vector<8x256xf32> to vector<8x64xf32>
    %61 = vector.extract_strided_slice %58 {offsets = [0, 64], sizes = [8, 64], strides = [1, 1]} : vector<8x256xf32> to vector<8x64xf32>
    %62 = vector.extract_strided_slice %59 {offsets = [0, 128], sizes = [8, 64], strides = [1, 1]} : vector<8x256xf32> to vector<8x64xf32>
    %63 = vector.extract_strided_slice %58 {offsets = [0, 192], sizes = [8, 64], strides = [1, 1]} : vector<8x256xf32> to vector<8x64xf32>
    %64 = arith.mulf %61, %41 : vector<8x64xf32>
    %65 = arith.mulf %60, %62 : vector<8x64xf32>
    %66 = arith.addf %64, %65 : vector<8x64xf32>
    %67 = math.tanh %66 : vector<8x64xf32>
    %68 = arith.mulf %63, %67 : vector<8x64xf32>
    %c1_i32 = arith.constant 1 : i32
    %69 = vector.broadcast %c1_i32 : i32 to vector<8x64xi32>
    %70 = arith.cmpi sgt, %10, %69 : vector<8x64xi32>
    %71 = arith.select %70, %68, %40 : vector<8x64xi1>, vector<8x64xf32>
    %72 = arith.select %70, %66, %41 : vector<8x64xi1>, vector<8x64xf32>
    %73 = arith.mulf %9, %68 : vector<8x64xf32>
    %cst_26 = arith.constant 0xFF800000 : f32
    %74 = vector.broadcast %cst_26 : f32 to vector<8x64xf32>
    %75 = arith.select %70, %73, %74 : vector<8x64xi1>, vector<8x64xf32>
    %76 = arith.maximumf %45, %75 : vector<8x64xf32>
    %c2 = arith.constant 2 : index
    %c0_27 = arith.constant 0 : index
    %c0_28 = arith.constant 0 : index
    %77 = vector.load %arg1[%c2, %c0_27, %c0_28] : memref<8x8x64xbf16, #tpu.memory_space<vmem>>, vector<1x8x64xbf16>
    %78 = vector.shape_cast %77 : vector<1x8x64xbf16> to vector<8x64xbf16>
    %cst_29 = arith.constant dense<0.000000e+00> : vector<8x256xf32>
    %79 = tpu.matmul %78, %1, %cst_29 {dimension_numbers = #tpu.dot_dimension_numbers<[1], [0], [0], [1], [0, 0, 1, 1], [], []>} : vector<8x64xbf16>, vector<64x256xbf16>, vector<8x256xf32> -> vector<8x256xf32>
    %80 = arith.truncf %71 : vector<8x64xf32> to vector<8x64xbf16>
    %cst_30 = arith.constant dense<0.000000e+00> : vector<8x256xf32>
    %81 = tpu.matmul %80, %3, %cst_30 {dimension_numbers = #tpu.dot_dimension_numbers<[1], [0], [0], [1], [0, 0, 1, 1], [], []>} : vector<8x64xbf16>, vector<64x256xbf16>, vector<8x256xf32> -> vector<8x256xf32>
    %82 = arith.addf %79, %81 : vector<8x256xf32>
    %83 = vector.broadcast %4 : vector<1x256xf32> to vector<8x256xf32>
    %84 = arith.addf %82, %83 : vector<8x256xf32>
    %85 = arith.negf %84 : vector<8x256xf32>
    %86 = math.exp %85 : vector<8x256xf32>
    %cst_31 = arith.constant 1.000000e+00 : f32
    %87 = vector.broadcast %cst_31 : f32 to vector<8x256xf32>
    %88 = arith.addf %87, %86 : vector<8x256xf32>
    %89 = arith.divf %87, %88 : vector<8x256xf32>
    %90 = math.tanh %84 : vector<8x256xf32>
    %91 = vector.extract_strided_slice %89 {offsets = [0, 0], sizes = [8, 64], strides = [1, 1]} : vector<8x256xf32> to vector<8x64xf32>
    %92 = vector.extract_strided_slice %89 {offsets = [0, 64], sizes = [8, 64], strides = [1, 1]} : vector<8x256xf32> to vector<8x64xf32>
    %93 = vector.extract_strided_slice %90 {offsets = [0, 128], sizes = [8, 64], strides = [1, 1]} : vector<8x256xf32> to vector<8x64xf32>
    %94 = vector.extract_strided_slice %89 {offsets = [0, 192], sizes = [8, 64], strides = [1, 1]} : vector<8x256xf32> to vector<8x64xf32>
    %95 = arith.mulf %92, %72 : vector<8x64xf32>
    %96 = arith.mulf %91, %93 : vector<8x64xf32>
    %97 = arith.addf %95, %96 : vector<8x64xf32>
    %98 = math.tanh %97 : vector<8x64xf32>
    %99 = arith.mulf %94, %98 : vector<8x64xf32>
    %c2_i32 = arith.constant 2 : i32
    %100 = vector.broadcast %c2_i32 : i32 to vector<8x64xi32>
    %101 = arith.cmpi sgt, %10, %100 : vector<8x64xi32>
    %102 = arith.select %101, %99, %71 : vector<8x64xi1>, vector<8x64xf32>
    %103 = arith.select %101, %97, %72 : vector<8x64xi1>, vector<8x64xf32>
    %104 = arith.mulf %9, %99 : vector<8x64xf32>
    %cst_32 = arith.constant 0xFF800000 : f32
    %105 = vector.broadcast %cst_32 : f32 to vector<8x64xf32>
    %106 = arith.select %101, %104, %105 : vector<8x64xi1>, vector<8x64xf32>
    %107 = arith.maximumf %76, %106 : vector<8x64xf32>
    %c3 = arith.constant 3 : index
    %c0_33 = arith.constant 0 : index
    %c0_34 = arith.constant 0 : index
    %108 = vector.load %arg1[%c3, %c0_33, %c0_34] : memref<8x8x64xbf16, #tpu.memory_space<vmem>>, vector<1x8x64xbf16>
    %109 = vector.shape_cast %108 : vector<1x8x64xbf16> to vector<8x64xbf16>
    %cst_35 = arith.constant dense<0.000000e+00> : vector<8x256xf32>
    %110 = tpu.matmul %109, %1, %cst_35 {dimension_numbers = #tpu.dot_dimension_numbers<[1], [0], [0], [1], [0, 0, 1, 1], [], []>} : vector<8x64xbf16>, vector<64x256xbf16>, vector<8x256xf32> -> vector<8x256xf32>
    %111 = arith.truncf %102 : vector<8x64xf32> to vector<8x64xbf16>
    %cst_36 = arith.constant dense<0.000000e+00> : vector<8x256xf32>
    %112 = tpu.matmul %111, %3, %cst_36 {dimension_numbers = #tpu.dot_dimension_numbers<[1], [0], [0], [1], [0, 0, 1, 1], [], []>} : vector<8x64xbf16>, vector<64x256xbf16>, vector<8x256xf32> -> vector<8x256xf32>
    %113 = arith.addf %110, %112 : vector<8x256xf32>
    %114 = vector.broadcast %4 : vector<1x256xf32> to vector<8x256xf32>
    %115 = arith.addf %113, %114 : vector<8x256xf32>
    %116 = arith.negf %115 : vector<8x256xf32>
    %117 = math.exp %116 : vector<8x256xf32>
    %cst_37 = arith.constant 1.000000e+00 : f32
    %118 = vector.broadcast %cst_37 : f32 to vector<8x256xf32>
    %119 = arith.addf %118, %117 : vector<8x256xf32>
    %120 = arith.divf %118, %119 : vector<8x256xf32>
    %121 = math.tanh %115 : vector<8x256xf32>
    %122 = vector.extract_strided_slice %120 {offsets = [0, 0], sizes = [8, 64], strides = [1, 1]} : vector<8x256xf32> to vector<8x64xf32>
    %123 = vector.extract_strided_slice %120 {offsets = [0, 64], sizes = [8, 64], strides = [1, 1]} : vector<8x256xf32> to vector<8x64xf32>
    %124 = vector.extract_strided_slice %121 {offsets = [0, 128], sizes = [8, 64], strides = [1, 1]} : vector<8x256xf32> to vector<8x64xf32>
    %125 = vector.extract_strided_slice %120 {offsets = [0, 192], sizes = [8, 64], strides = [1, 1]} : vector<8x256xf32> to vector<8x64xf32>
    %126 = arith.mulf %123, %103 : vector<8x64xf32>
    %127 = arith.mulf %122, %124 : vector<8x64xf32>
    %128 = arith.addf %126, %127 : vector<8x64xf32>
    %129 = math.tanh %128 : vector<8x64xf32>
    %130 = arith.mulf %125, %129 : vector<8x64xf32>
    %c3_i32 = arith.constant 3 : i32
    %131 = vector.broadcast %c3_i32 : i32 to vector<8x64xi32>
    %132 = arith.cmpi sgt, %10, %131 : vector<8x64xi32>
    %133 = arith.select %132, %130, %102 : vector<8x64xi1>, vector<8x64xf32>
    %134 = arith.select %132, %128, %103 : vector<8x64xi1>, vector<8x64xf32>
    %135 = arith.mulf %9, %130 : vector<8x64xf32>
    %cst_38 = arith.constant 0xFF800000 : f32
    %136 = vector.broadcast %cst_38 : f32 to vector<8x64xf32>
    %137 = arith.select %132, %135, %136 : vector<8x64xi1>, vector<8x64xf32>
    %138 = arith.maximumf %107, %137 : vector<8x64xf32>
    %c4 = arith.constant 4 : index
    %c0_39 = arith.constant 0 : index
    %c0_40 = arith.constant 0 : index
    %139 = vector.load %arg1[%c4, %c0_39, %c0_40] : memref<8x8x64xbf16, #tpu.memory_space<vmem>>, vector<1x8x64xbf16>
    %140 = vector.shape_cast %139 : vector<1x8x64xbf16> to vector<8x64xbf16>
    %cst_41 = arith.constant dense<0.000000e+00> : vector<8x256xf32>
    %141 = tpu.matmul %140, %1, %cst_41 {dimension_numbers = #tpu.dot_dimension_numbers<[1], [0], [0], [1], [0, 0, 1, 1], [], []>} : vector<8x64xbf16>, vector<64x256xbf16>, vector<8x256xf32> -> vector<8x256xf32>
    %142 = arith.truncf %133 : vector<8x64xf32> to vector<8x64xbf16>
    %cst_42 = arith.constant dense<0.000000e+00> : vector<8x256xf32>
    %143 = tpu.matmul %142, %3, %cst_42 {dimension_numbers = #tpu.dot_dimension_numbers<[1], [0], [0], [1], [0, 0, 1, 1], [], []>} : vector<8x64xbf16>, vector<64x256xbf16>, vector<8x256xf32> -> vector<8x256xf32>
    %144 = arith.addf %141, %143 : vector<8x256xf32>
    %145 = vector.broadcast %4 : vector<1x256xf32> to vector<8x256xf32>
    %146 = arith.addf %144, %145 : vector<8x256xf32>
    %147 = arith.negf %146 : vector<8x256xf32>
    %148 = math.exp %147 : vector<8x256xf32>
    %cst_43 = arith.constant 1.000000e+00 : f32
    %149 = vector.broadcast %cst_43 : f32 to vector<8x256xf32>
    %150 = arith.addf %149, %148 : vector<8x256xf32>
    %151 = arith.divf %149, %150 : vector<8x256xf32>
    %152 = math.tanh %146 : vector<8x256xf32>
    %153 = vector.extract_strided_slice %151 {offsets = [0, 0], sizes = [8, 64], strides = [1, 1]} : vector<8x256xf32> to vector<8x64xf32>
    %154 = vector.extract_strided_slice %151 {offsets = [0, 64], sizes = [8, 64], strides = [1, 1]} : vector<8x256xf32> to vector<8x64xf32>
    %155 = vector.extract_strided_slice %152 {offsets = [0, 128], sizes = [8, 64], strides = [1, 1]} : vector<8x256xf32> to vector<8x64xf32>
    %156 = vector.extract_strided_slice %151 {offsets = [0, 192], sizes = [8, 64], strides = [1, 1]} : vector<8x256xf32> to vector<8x64xf32>
    %157 = arith.mulf %154, %134 : vector<8x64xf32>
    %158 = arith.mulf %153, %155 : vector<8x64xf32>
    %159 = arith.addf %157, %158 : vector<8x64xf32>
    %160 = math.tanh %159 : vector<8x64xf32>
    %161 = arith.mulf %156, %160 : vector<8x64xf32>
    %c4_i32 = arith.constant 4 : i32
    %162 = vector.broadcast %c4_i32 : i32 to vector<8x64xi32>
    %163 = arith.cmpi sgt, %10, %162 : vector<8x64xi32>
    %164 = arith.select %163, %161, %133 : vector<8x64xi1>, vector<8x64xf32>
    %165 = arith.select %163, %159, %134 : vector<8x64xi1>, vector<8x64xf32>
    %166 = arith.mulf %9, %161 : vector<8x64xf32>
    %cst_44 = arith.constant 0xFF800000 : f32
    %167 = vector.broadcast %cst_44 : f32 to vector<8x64xf32>
    %168 = arith.select %163, %166, %167 : vector<8x64xi1>, vector<8x64xf32>
    %169 = arith.maximumf %138, %168 : vector<8x64xf32>
    %c5 = arith.constant 5 : index
    %c0_45 = arith.constant 0 : index
    %c0_46 = arith.constant 0 : index
    %170 = vector.load %arg1[%c5, %c0_45, %c0_46] : memref<8x8x64xbf16, #tpu.memory_space<vmem>>, vector<1x8x64xbf16>
    %171 = vector.shape_cast %170 : vector<1x8x64xbf16> to vector<8x64xbf16>
    %cst_47 = arith.constant dense<0.000000e+00> : vector<8x256xf32>
    %172 = tpu.matmul %171, %1, %cst_47 {dimension_numbers = #tpu.dot_dimension_numbers<[1], [0], [0], [1], [0, 0, 1, 1], [], []>} : vector<8x64xbf16>, vector<64x256xbf16>, vector<8x256xf32> -> vector<8x256xf32>
    %173 = arith.truncf %164 : vector<8x64xf32> to vector<8x64xbf16>
    %cst_48 = arith.constant dense<0.000000e+00> : vector<8x256xf32>
    %174 = tpu.matmul %173, %3, %cst_48 {dimension_numbers = #tpu.dot_dimension_numbers<[1], [0], [0], [1], [0, 0, 1, 1], [], []>} : vector<8x64xbf16>, vector<64x256xbf16>, vector<8x256xf32> -> vector<8x256xf32>
    %175 = arith.addf %172, %174 : vector<8x256xf32>
    %176 = vector.broadcast %4 : vector<1x256xf32> to vector<8x256xf32>
    %177 = arith.addf %175, %176 : vector<8x256xf32>
    %178 = arith.negf %177 : vector<8x256xf32>
    %179 = math.exp %178 : vector<8x256xf32>
    %cst_49 = arith.constant 1.000000e+00 : f32
    %180 = vector.broadcast %cst_49 : f32 to vector<8x256xf32>
    %181 = arith.addf %180, %179 : vector<8x256xf32>
    %182 = arith.divf %180, %181 : vector<8x256xf32>
    %183 = math.tanh %177 : vector<8x256xf32>
    %184 = vector.extract_strided_slice %182 {offsets = [0, 0], sizes = [8, 64], strides = [1, 1]} : vector<8x256xf32> to vector<8x64xf32>
    %185 = vector.extract_strided_slice %182 {offsets = [0, 64], sizes = [8, 64], strides = [1, 1]} : vector<8x256xf32> to vector<8x64xf32>
    %186 = vector.extract_strided_slice %183 {offsets = [0, 128], sizes = [8, 64], strides = [1, 1]} : vector<8x256xf32> to vector<8x64xf32>
    %187 = vector.extract_strided_slice %182 {offsets = [0, 192], sizes = [8, 64], strides = [1, 1]} : vector<8x256xf32> to vector<8x64xf32>
    %188 = arith.mulf %185, %165 : vector<8x64xf32>
    %189 = arith.mulf %184, %186 : vector<8x64xf32>
    %190 = arith.addf %188, %189 : vector<8x64xf32>
    %191 = math.tanh %190 : vector<8x64xf32>
    %192 = arith.mulf %187, %191 : vector<8x64xf32>
    %c5_i32 = arith.constant 5 : i32
    %193 = vector.broadcast %c5_i32 : i32 to vector<8x64xi32>
    %194 = arith.cmpi sgt, %10, %193 : vector<8x64xi32>
    %195 = arith.select %194, %192, %164 : vector<8x64xi1>, vector<8x64xf32>
    %196 = arith.select %194, %190, %165 : vector<8x64xi1>, vector<8x64xf32>
    %197 = arith.mulf %9, %192 : vector<8x64xf32>
    %cst_50 = arith.constant 0xFF800000 : f32
    %198 = vector.broadcast %cst_50 : f32 to vector<8x64xf32>
    %199 = arith.select %194, %197, %198 : vector<8x64xi1>, vector<8x64xf32>
    %200 = arith.maximumf %169, %199 : vector<8x64xf32>
    %c6 = arith.constant 6 : index
    %c0_51 = arith.constant 0 : index
    %c0_52 = arith.constant 0 : index
    %201 = vector.load %arg1[%c6, %c0_51, %c0_52] : memref<8x8x64xbf16, #tpu.memory_space<vmem>>, vector<1x8x64xbf16>
    %202 = vector.shape_cast %201 : vector<1x8x64xbf16> to vector<8x64xbf16>
    %cst_53 = arith.constant dense<0.000000e+00> : vector<8x256xf32>
    %203 = tpu.matmul %202, %1, %cst_53 {dimension_numbers = #tpu.dot_dimension_numbers<[1], [0], [0], [1], [0, 0, 1, 1], [], []>} : vector<8x64xbf16>, vector<64x256xbf16>, vector<8x256xf32> -> vector<8x256xf32>
    %204 = arith.truncf %195 : vector<8x64xf32> to vector<8x64xbf16>
    %cst_54 = arith.constant dense<0.000000e+00> : vector<8x256xf32>
    %205 = tpu.matmul %204, %3, %cst_54 {dimension_numbers = #tpu.dot_dimension_numbers<[1], [0], [0], [1], [0, 0, 1, 1], [], []>} : vector<8x64xbf16>, vector<64x256xbf16>, vector<8x256xf32> -> vector<8x256xf32>
    %206 = arith.addf %203, %205 : vector<8x256xf32>
    %207 = vector.broadcast %4 : vector<1x256xf32> to vector<8x256xf32>
    %208 = arith.addf %206, %207 : vector<8x256xf32>
    %209 = arith.negf %208 : vector<8x256xf32>
    %210 = math.exp %209 : vector<8x256xf32>
    %cst_55 = arith.constant 1.000000e+00 : f32
    %211 = vector.broadcast %cst_55 : f32 to vector<8x256xf32>
    %212 = arith.addf %211, %210 : vector<8x256xf32>
    %213 = arith.divf %211, %212 : vector<8x256xf32>
    %214 = math.tanh %208 : vector<8x256xf32>
    %215 = vector.extract_strided_slice %213 {offsets = [0, 0], sizes = [8, 64], strides = [1, 1]} : vector<8x256xf32> to vector<8x64xf32>
    %216 = vector.extract_strided_slice %213 {offsets = [0, 64], sizes = [8, 64], strides = [1, 1]} : vector<8x256xf32> to vector<8x64xf32>
    %217 = vector.extract_strided_slice %214 {offsets = [0, 128], sizes = [8, 64], strides = [1, 1]} : vector<8x256xf32> to vector<8x64xf32>
    %218 = vector.extract_strided_slice %213 {offsets = [0, 192], sizes = [8, 64], strides = [1, 1]} : vector<8x256xf32> to vector<8x64xf32>
    %219 = arith.mulf %216, %196 : vector<8x64xf32>
    %220 = arith.mulf %215, %217 : vector<8x64xf32>
    %221 = arith.addf %219, %220 : vector<8x64xf32>
    %222 = math.tanh %221 : vector<8x64xf32>
    %223 = arith.mulf %218, %222 : vector<8x64xf32>
    %c6_i32 = arith.constant 6 : i32
    %224 = vector.broadcast %c6_i32 : i32 to vector<8x64xi32>
    %225 = arith.cmpi sgt, %10, %224 : vector<8x64xi32>
    %226 = arith.select %225, %223, %195 : vector<8x64xi1>, vector<8x64xf32>
    %227 = arith.select %225, %221, %196 : vector<8x64xi1>, vector<8x64xf32>
    %228 = arith.mulf %9, %223 : vector<8x64xf32>
    %cst_56 = arith.constant 0xFF800000 : f32
    %229 = vector.broadcast %cst_56 : f32 to vector<8x64xf32>
    %230 = arith.select %225, %228, %229 : vector<8x64xi1>, vector<8x64xf32>
    %231 = arith.maximumf %200, %230 : vector<8x64xf32>
    %c7 = arith.constant 7 : index
    %c0_57 = arith.constant 0 : index
    %c0_58 = arith.constant 0 : index
    %232 = vector.load %arg1[%c7, %c0_57, %c0_58] : memref<8x8x64xbf16, #tpu.memory_space<vmem>>, vector<1x8x64xbf16>
    %233 = vector.shape_cast %232 : vector<1x8x64xbf16> to vector<8x64xbf16>
    %cst_59 = arith.constant dense<0.000000e+00> : vector<8x256xf32>
    %234 = tpu.matmul %233, %1, %cst_59 {dimension_numbers = #tpu.dot_dimension_numbers<[1], [0], [0], [1], [0, 0, 1, 1], [], []>} : vector<8x64xbf16>, vector<64x256xbf16>, vector<8x256xf32> -> vector<8x256xf32>
    %235 = arith.truncf %226 : vector<8x64xf32> to vector<8x64xbf16>
    %cst_60 = arith.constant dense<0.000000e+00> : vector<8x256xf32>
    %236 = tpu.matmul %235, %3, %cst_60 {dimension_numbers = #tpu.dot_dimension_numbers<[1], [0], [0], [1], [0, 0, 1, 1], [], []>} : vector<8x64xbf16>, vector<64x256xbf16>, vector<8x256xf32> -> vector<8x256xf32>
    %237 = arith.addf %234, %236 : vector<8x256xf32>
    %238 = vector.broadcast %4 : vector<1x256xf32> to vector<8x256xf32>
    %239 = arith.addf %237, %238 : vector<8x256xf32>
    %240 = arith.negf %239 : vector<8x256xf32>
    %241 = math.exp %240 : vector<8x256xf32>
    %cst_61 = arith.constant 1.000000e+00 : f32
    %242 = vector.broadcast %cst_61 : f32 to vector<8x256xf32>
    %243 = arith.addf %242, %241 : vector<8x256xf32>
    %244 = arith.divf %242, %243 : vector<8x256xf32>
    %245 = math.tanh %239 : vector<8x256xf32>
    %246 = vector.extract_strided_slice %244 {offsets = [0, 0], sizes = [8, 64], strides = [1, 1]} : vector<8x256xf32> to vector<8x64xf32>
    %247 = vector.extract_strided_slice %244 {offsets = [0, 64], sizes = [8, 64], strides = [1, 1]} : vector<8x256xf32> to vector<8x64xf32>
    %248 = vector.extract_strided_slice %245 {offsets = [0, 128], sizes = [8, 64], strides = [1, 1]} : vector<8x256xf32> to vector<8x64xf32>
    %249 = vector.extract_strided_slice %244 {offsets = [0, 192], sizes = [8, 64], strides = [1, 1]} : vector<8x256xf32> to vector<8x64xf32>
    %250 = arith.mulf %247, %227 : vector<8x64xf32>
    %251 = arith.mulf %246, %248 : vector<8x64xf32>
    %252 = arith.addf %250, %251 : vector<8x64xf32>
    %253 = math.tanh %252 : vector<8x64xf32>
    %254 = arith.mulf %249, %253 : vector<8x64xf32>
    %c7_i32 = arith.constant 7 : i32
    %255 = vector.broadcast %c7_i32 : i32 to vector<8x64xi32>
    %256 = arith.cmpi sgt, %10, %255 : vector<8x64xi32>
    %257 = arith.mulf %9, %254 : vector<8x64xf32>
    %cst_62 = arith.constant 0xFF800000 : f32
    %258 = vector.broadcast %cst_62 : f32 to vector<8x64xf32>
    %259 = arith.select %256, %257, %258 : vector<8x64xi1>, vector<8x64xf32>
    %260 = arith.maximumf %231, %259 : vector<8x64xf32>
    %c0_63 = arith.constant 0 : index
    %c0_64 = arith.constant 0 : index
    %261 = vector.load %arg5[%c0_63, %c0_64] : memref<1x64xi32, #tpu.memory_space<vmem>>, vector<1x64xi32>
    %262 = vector.broadcast %261 : vector<1x64xi32> to vector<8x64xi32>
    %263 = arith.cmpi slt, %10, %262 : vector<8x64xi32>
    %cst_65 = arith.constant 0.000000e+00 : f32
    %264 = vector.broadcast %cst_65 : f32 to vector<8x64xf32>
    %265 = arith.maximumf %260, %264 : vector<8x64xf32>
    %266 = arith.select %263, %265, %260 : vector<8x64xi1>, vector<8x64xf32>
    %c0_i32_66 = arith.constant 0 : i32
    %267 = vector.broadcast %c0_i32_66 : i32 to vector<8x64xi32>
    %268 = arith.cmpi sgt, %10, %267 : vector<8x64xi32>
    %cst_67 = arith.constant 0.000000e+00 : f32
    %269 = vector.broadcast %cst_67 : f32 to vector<8x64xf32>
    %270 = arith.select %268, %266, %269 : vector<8x64xi1>, vector<8x64xf32>
    %c0_68 = arith.constant 0 : index
    %c0_69 = arith.constant 0 : index
    %271 = vector.load %arg2[%c0_68, %c0_69] : memref<8x96xbf16, #tpu.memory_space<vmem>>, vector<8x96xbf16>
    %c0_70 = arith.constant 0 : index
    %c0_71 = arith.constant 0 : index
    %272 = vector.load %arg9[%c0_70, %c0_71] : memref<96x256xbf16, #tpu.memory_space<vmem>>, vector<96x256xbf16>
    %cst_72 = arith.constant dense<0.000000e+00> : vector<8x256xf32>
    %273 = tpu.matmul %271, %272, %cst_72 {dimension_numbers = #tpu.dot_dimension_numbers<[1], [0], [0], [1], [0, 0, 1, 1], [], []>} : vector<8x96xbf16>, vector<96x256xbf16>, vector<8x256xf32> -> vector<8x256xf32>
    %274 = arith.truncf %270 : vector<8x64xf32> to vector<8x64xbf16>
    %c0_73 = arith.constant 0 : index
    %c0_74 = arith.constant 0 : index
    %275 = vector.load %arg10[%c0_73, %c0_74] : memref<64x256xbf16, #tpu.memory_space<vmem>>, vector<64x256xbf16>
    %cst_75 = arith.constant dense<0.000000e+00> : vector<8x256xf32>
    %276 = tpu.matmul %274, %275, %cst_75 {dimension_numbers = #tpu.dot_dimension_numbers<[1], [0], [0], [1], [0, 0, 1, 1], [], []>} : vector<8x64xbf16>, vector<64x256xbf16>, vector<8x256xf32> -> vector<8x256xf32>
    %277 = arith.addf %273, %276 : vector<8x256xf32>
    %c0_76 = arith.constant 0 : index
    %c0_77 = arith.constant 0 : index
    %278 = vector.load %arg11[%c0_76, %c0_77] : memref<1x256xf32, #tpu.memory_space<vmem>>, vector<1x256xf32>
    %279 = vector.broadcast %278 : vector<1x256xf32> to vector<8x256xf32>
    %280 = arith.addf %277, %279 : vector<8x256xf32>
    %cst_78 = arith.constant 0.000000e+00 : f32
    %281 = vector.broadcast %cst_78 : f32 to vector<8x256xf32>
    %282 = arith.cmpf ogt, %280, %281 : vector<8x256xf32>
    %cst_79 = arith.constant 0.00999999977 : f32
    %283 = vector.broadcast %cst_79 : f32 to vector<8x256xf32>
    %284 = arith.mulf %283, %280 : vector<8x256xf32>
    %285 = arith.select %282, %280, %284 : vector<8x256xi1>, vector<8x256xf32>
    %286 = arith.truncf %285 : vector<8x256xf32> to vector<8x256xbf16>
    %c0_80 = arith.constant 0 : index
    %c0_81 = arith.constant 0 : index
    %287 = vector.load %arg12[%c0_80, %c0_81] : memref<256x128xbf16, #tpu.memory_space<vmem>>, vector<256x128xbf16>
    %cst_82 = arith.constant dense<0.000000e+00> : vector<8x128xf32>
    %288 = tpu.matmul %286, %287, %cst_82 {dimension_numbers = #tpu.dot_dimension_numbers<[1], [0], [0], [1], [0, 0, 1, 1], [], []>} : vector<8x256xbf16>, vector<256x128xbf16>, vector<8x128xf32> -> vector<8x128xf32>
    %c0_83 = arith.constant 0 : index
    %c0_84 = arith.constant 0 : index
    %289 = vector.load %arg13[%c0_83, %c0_84] : memref<1x128xf32, #tpu.memory_space<vmem>>, vector<1x128xf32>
    %290 = vector.broadcast %289 : vector<1x128xf32> to vector<8x128xf32>
    %291 = arith.addf %288, %290 : vector<8x128xf32>
    %cst_85 = arith.constant 0.000000e+00 : f32
    %292 = vector.broadcast %cst_85 : f32 to vector<8x128xf32>
    %293 = arith.cmpf ogt, %291, %292 : vector<8x128xf32>
    %cst_86 = arith.constant 0.00999999977 : f32
    %294 = vector.broadcast %cst_86 : f32 to vector<8x128xf32>
    %295 = arith.mulf %294, %291 : vector<8x128xf32>
    %296 = arith.select %293, %291, %295 : vector<8x128xi1>, vector<8x128xf32>
    %c0_87 = arith.constant 0 : index
    %c0_88 = arith.constant 0 : index
    %297 = vector.load %arg14[%c0_87, %c0_88] : memref<1x128xbf16, #tpu.memory_space<vmem>>, vector<1x128xbf16>
    %298 = arith.truncf %296 : vector<8x128xf32> to vector<8x128xbf16>
    %cst_89 = arith.constant dense<0.000000e+00> : vector<1x8xf32>
    %299 = tpu.matmul %297, %298, %cst_89 {dimension_numbers = #tpu.dot_dimension_numbers<[1], [1], [0], [0], [0, 0, 1, 0], [], []>} : vector<1x128xbf16>, vector<8x128xbf16>, vector<1x8xf32> -> vector<1x8xf32>
    %c0_90 = arith.constant 0 : index
    %c0_91 = arith.constant 0 : index
    %300 = vector.load %arg15[%c0_90, %c0_91] : memref<1x1xf32, #tpu.memory_space<vmem>>, vector<1x1xf32>
    %301 = vector.broadcast %300 : vector<1x1xf32> to vector<1x8xf32>
    %302 = arith.addf %299, %301 : vector<1x8xf32>
    %c0_92 = arith.constant 0 : index
    %c0_93 = arith.constant 0 : index
    %303 = vector.load %arg16[%c0_92, %c0_93] : memref<1x8xf32, #tpu.memory_space<vmem>>, vector<1x8xf32>
    tpu.vector_store %arg16[%c0_92, %c0_93], %302 {strides = array<i32>} : memref<1x8xf32, #tpu.memory_space<vmem>>, vector<1x8xf32>,
    return
  }
  func.func @transform_0(%arg0: i32) -> (i32, i32, i32) {
    %c0_i32 = arith.constant 0 : i32
    %c0_i32_0 = arith.constant 0 : i32
    %c0_i32_1 = arith.constant 0 : i32
    return %c0_i32, %arg0, %c0_i32_0 : i32, i32, i32
  }
  func.func @transform_1(%arg0: i32) -> (i32, i32) {
    %c0_i32 = arith.constant 0 : i32
    %c0_i32_0 = arith.constant 0 : i32
    return %arg0, %c0_i32 : i32, i32
  }
  func.func @transform_2(%arg0: i32) -> (i32, i32) {
    %c0_i32 = arith.constant 0 : i32
    %c0_i32_0 = arith.constant 0 : i32
    return %arg0, %c0_i32 : i32, i32
  }
  func.func @transform_3(%arg0: i32) -> (i32, i32) {
    %c0_i32 = arith.constant 0 : i32
    %c0_i32_0 = arith.constant 0 : i32
    return %arg0, %c0_i32 : i32, i32
  }
  func.func @transform_4(%arg0: i32) -> (i32, i32) {
    %c0_i32 = arith.constant 0 : i32
    %c0_i32_0 = arith.constant 0 : i32
    %c0_i32_1 = arith.constant 0 : i32
    return %c0_i32, %c0_i32_0 : i32, i32
  }
  func.func @transform_5(%arg0: i32) -> (i32, i32) {
    %c0_i32 = arith.constant 0 : i32
    %c0_i32_0 = arith.constant 0 : i32
    %c0_i32_1 = arith.constant 0 : i32
    return %c0_i32, %c0_i32_0 : i32, i32
  }
  func.func @transform_6(%arg0: i32) -> (i32, i32) {
    %c0_i32 = arith.constant 0 : i32
    %c0_i32_0 = arith.constant 0 : i32
    %c0_i32_1 = arith.constant 0 : i32
    return %c0_i32, %c0_i32_0 : i32, i32
  }
  func.func @transform_7(%arg0: i32) -> (i32, i32) {
    %c0_i32 = arith.constant 0 : i32
    %c0_i32_0 = arith.constant 0 : i32
    %c0_i32_1 = arith.constant 0 : i32
    return %c0_i32, %c0_i32_0 : i32, i32
  }
  func.func @transform_8(%arg0: i32) -> (i32, i32) {
    %c0_i32 = arith.constant 0 : i32
    %c0_i32_0 = arith.constant 0 : i32
    %c0_i32_1 = arith.constant 0 : i32
    return %c0_i32, %c0_i32_0 : i32, i32
  }
  func.func @transform_9(%arg0: i32) -> (i32, i32) {
    %c0_i32 = arith.constant 0 : i32
    %c0_i32_0 = arith.constant 0 : i32
    %c0_i32_1 = arith.constant 0 : i32
    return %c0_i32, %c0_i32_0 : i32, i32
  }
  func.func @transform_10(%arg0: i32) -> (i32, i32) {
    %c0_i32 = arith.constant 0 : i32
    %c0_i32_0 = arith.constant 0 : i32
    %c0_i32_1 = arith.constant 0 : i32
    return %c0_i32, %c0_i32_0 : i32, i32
  }
  func.func @transform_11(%arg0: i32) -> (i32, i32) {
    %c0_i32 = arith.constant 0 : i32
    %c0_i32_0 = arith.constant 0 : i32
    %c0_i32_1 = arith.constant 0 : i32
    return %c0_i32, %c0_i32_0 : i32, i32
  }
  func.func @transform_12(%arg0: i32) -> (i32, i32) {
    %c0_i32 = arith.constant 0 : i32
    %c0_i32_0 = arith.constant 0 : i32
    %c0_i32_1 = arith.constant 0 : i32
    return %c0_i32, %c0_i32_0 : i32, i32
  }
  func.func @transform_13(%arg0: i32) -> (i32, i32) {
    %c0_i32 = arith.constant 0 : i32
    %c0_i32_0 = arith.constant 0 : i32
    %c0_i32_1 = arith.constant 0 : i32
    return %c0_i32, %c0_i32_0 : i32, i32
  }
  func.func @transform_14(%arg0: i32) -> (i32, i32) {
    %c0_i32 = arith.constant 0 : i32
    %c0_i32_0 = arith.constant 0 : i32
    %c0_i32_1 = arith.constant 0 : i32
    return %c0_i32, %c0_i32_0 : i32, i32
  }
  func.func @transform_15(%arg0: i32) -> (i32, i32) {
    %c0_i32 = arith.constant 0 : i32
    %c0_i32_0 = arith.constant 0 : i32
    return %c0_i32, %arg0 : i32, i32
  }
}

</mosaic_0001>

<bundles_post_ra>
// kernel: tpu_custom_call.1
= control target key start
LH: loop header
LB: loop body
LE: loop exit
PB: predicated region body
PF: predicated region fallthrough
CT: control target
= control target key end

     0   :  { %s3006_s0 = inlined_call_operand.hbm [shape: bf16[8,8,64], index: 0, kind: input, shape index: {}]   ;;  %s3007_s1 = inlined_call_operand.hbm [shape: bf16[8,96], index: 1, kind: input, shape index: {}]   ;;  %s3008_s2 = inlined_call_operand.hbm [shape: s32[8,64], index: 2, kind: input, shape index: {}]   ;;  %s3009_s3 = inlined_call_operand.hbm [shape: f32[8,128], index: 3, kind: input, shape index: {}]   ;;  %s3010_s4 = inlined_call_operand.vmem [shape: s32[1,64], index: 4, kind: input, shape index: {}]   ;;  %s3011_s5 = inlined_call_operand.hbm [shape: bf16[64,320], index: 5, kind: input, shape index: {}]   ;;  %s3012_s6 = inlined_call_operand.hbm [shape: bf16[64,256], index: 6, kind: input, shape index: {}]   ;;  %s3013_s7 = inlined_call_operand.vmem [shape: f32[1,256], index: 7, kind: input, shape index: {}]   ;;  %s3014_s8 = inlined_call_operand.hbm [shape: bf16[96,256], index: 8, kind: input, shape index: {}]   ;;  %s3015_s9 = inlined_call_operand.hbm [shape: bf16[64,256], index: 9, kind: input, shape index: {}]   ;;  %s3016_s10 = inlined_call_operand.vmem [shape: f32[1,256], index: 10, kind: input, shape index: {}]   ;;  %s3017_s11 = inlined_call_operand.hbm [shape: bf16[256,128], index: 11, kind: input, shape index: {}]   ;;  %s3018_s12 = inlined_call_operand.vmem [shape: f32[1,128], index: 12, kind: input, shape index: {}]   ;;  %s3019_s13 = inlined_call_operand.vmem [shape: bf16[1,128], index: 13, kind: input, shape index: {}]   ;;  %s3020_s14 = inlined_call_operand.<no memory space> [shape: f32[1,1], index: 14, kind: input, shape index: {}]   ;;  %s3021_s15 = inlined_call_operand.hbm [shape: f32[1,8], index: 15, kind: output, shape index: {}]  }
   0x1   :  { %v20_v0 = vstv %s3020_s14 }
   0x2   :  { %21 = vst [vmem:[#allocation2] sm:$0x1] %v20_v0 }
   0x3   :  { %22 = vsyncpa [#allocation4], 0 }
   0x4   :  { %23 = vsyncpa [#allocation7], 0 }
   0x5   :  { %24 = vsyncpa [#allocation10], 0 }
   0x6   :  { %25 = vsyncpa [#allocation13], 0 }
   0x7   :  { %26 = vsyncpa [#allocation16], 0 }
   0x8   :  { %27 = vsyncpa [#allocation5], 0  ;;  %s2453_s20 = smov [#allocation6]   ;;  %s2454_s22 = smov [#allocation9]  }
   0x9   :  { %s46_s21 = sshll.u32 %s2453_s20, 4  ;;  %s66_s23 = sshll.u32 %s2454_s22, 4  ;;  %s47_s21 = int_to_ptr.vmem [resolvable:$true] %s46_s21  ;;  %s67_s23 = int_to_ptr.vmem [resolvable:$true] %s66_s23 }
   0xa   :  { %s2249_s24 = scalar_lea.vmem %s47_s21, 64  ;;  %p2254_p1 = scmp.lt.s32.totalorder %s47_s21, %s47_s21 }
   0xb   :  { %p2250_p0 = scmp.ne.s32.totalorder %s47_s21, %s2249_s24  ;;  %p2255_p2 = scmp.lt.s32.totalorder %s2249_s24, %s2249_s24 }
   0xd   :  { %p2256_p3 = por %p2255_p2, %p2254_p1 }
   0xf   :  { %p2257_p4 = pnand %p2256_p3, %p2250_p0 }
  0x11   :  { %2260 = shalt.err (!%p2257_p4)
}
  0x12   :  { %49 = dma.hbm_to_vmem [thread:$0]  %s3007_s1, 64, %s47_s21, [#allocation7]  }
  0x13   :  { %s2269_s26 = scalar_lea.vmem %s67_s23, 128  ;;  %p2274_p6 = scmp.lt.s32.totalorder %s67_s23, %s67_s23 }
  0x14   :  { %p2270_p5 = scmp.ne.s32.totalorder %s67_s23, %s2269_s26  ;;  %p2275_p7 = scmp.lt.s32.totalorder %s2269_s26, %s2269_s26 }
  0x16   :  { %p2276_p8 = por %p2275_p7, %p2274_p6 }
  0x18   :  { %p2277_p9 = pnand %p2276_p8, %p2270_p5 }
  0x1a   :  { %2280 = shalt.err (!%p2277_p9)
}
  0x1b   :  { %69 = dma.hbm_to_vmem [thread:$0]  %s3009_s3, 128, %s67_s23, [#allocation10]  }
  0x1c   :  { %s2455_s29 = smov [#allocation12]  }
  0x1d   :  { %s89_s30 = sshll.u32 %s2455_s29, 4  ;;  %s90_s30 = int_to_ptr.vmem [resolvable:$true] %s89_s30 }
  0x1e   :  { %s2289_s16 = scalar_lea.vmem %s90_s30, 1024  ;;  %p2294_p11 = scmp.lt.s32.totalorder %s90_s30, %s90_s30 }
  0x1f   :  { %p2290_p10 = scmp.ne.s32.totalorder %s90_s30, %s2289_s16  ;;  %p2295_p12 = scmp.lt.s32.totalorder %s2289_s16, %s2289_s16 }
  0x21   :  { %p2296_p13 = por %p2295_p12, %p2294_p11 }
  0x23   :  { %p2297_p0 = pnand %p2296_p13, %p2290_p10 }
  0x25   :  { %2300 = shalt.err (!%p2297_p0)
}
  0x26   :  { %s2456_s1 = smov 128   ;;  %s2457_s17 = smov 8  }
  0x27   :  { %95 = dma.hbm_to_vmem [thread:$0]  %s3012_s6, 1024, %s90_s30, [#allocation13], %s2456_s1, %s2456_s1, %s2457_s17  }
  0x28   :  { %s2458_s3 = smov [#allocation15]   ;;  %s2459_s21 = smov [#allocation3]  }
  0x29   :  { %s115_s20 = sshll.u32 %s2458_s3, 4  ;;  %s33_s22 = sshll.u32 %s2459_s21, 4  ;;  %s116_s20 = int_to_ptr.vmem [resolvable:$true] %s115_s20  ;;  %s34_s22 = int_to_ptr.vmem [resolvable:$true] %s33_s22 }
  0x2a   :  { %s2309_s23 = scalar_lea.vmem %s116_s20, 1024  ;;  %p2314_p2 = scmp.lt.s32.totalorder %s116_s20, %s116_s20 }
  0x2b   :  { %p2310_p1 = scmp.ne.s32.totalorder %s116_s20, %s2309_s23  ;;  %p2315_p3 = scmp.lt.s32.totalorder %s2309_s23, %s2309_s23 }
  0x2d   :  { %p2316_p4 = por %p2315_p3, %p2314_p2 }
  0x2f   :  { %p2317_p5 = pnand %p2316_p4, %p2310_p1 }
  0x31   :  { %2320 = shalt.err (!%p2317_p5)
}
  0x32   :  { %121 = dma.hbm_to_vmem [thread:$0]  %s3015_s9, 1024, %s116_s20, [#allocation16], %s2456_s1, %s2456_s1, %s2457_s17  }
  0x33   :  { %s2329_s6 = scalar_lea.vmem %s34_s22, 512  ;;  %p2334_p7 = scmp.lt.s32.totalorder %s34_s22, %s34_s22 }
  0x34   :  { %p2330_p6 = scmp.ne.s32.totalorder %s34_s22, %s2329_s6  ;;  %p2335_p8 = scmp.lt.s32.totalorder %s2329_s6, %s2329_s6 }
  0x36   :  { %p2336_p9 = por %p2335_p8, %p2334_p7 }
  0x38   :  { %p2337_p10 = pnand %p2336_p9, %p2330_p6 }
  0x3a   :  { %2340 = shalt.err (!%p2337_p10)
}
  0x3b   :  { %s2460_s25 = smov 64   ;;  %s2461_s26 = smov 4  }
  0x3c   :  { %39 = dma.hbm_to_vmem [thread:$0]  %s3006_s0, 512, %s34_s22, [#allocation4], %s2460_s25, %s2460_s25, %s2461_s26  }
  0x3d   :  { %s2462_s29 = smov [#allocation8]   ;;  %s2463_s9 = smov [#allocation11]  }
  0x3e   :  { %s56_s30 = sshll.u32 %s2462_s29, 4  ;;  %s77_s16 = sshll.u32 %s2463_s9, 4  ;;  %s57_s30 = int_to_ptr.vmem [resolvable:$true] %s56_s30  ;;  %s78_s16 = int_to_ptr.vmem [resolvable:$true] %s77_s16 }
  0x3f   :  { %s2349_s18 = scalar_lea.vmem %s57_s30, 128  ;;  %p2354_p12 = scmp.lt.s32.totalorder %s57_s30, %s57_s30 }
  0x40   :  { %p2350_p11 = scmp.ne.s32.totalorder %s57_s30, %s2349_s18  ;;  %p2355_p13 = scmp.lt.s32.totalorder %s2349_s18, %s2349_s18 }
  0x42   :  { %p2356_p0 = por %p2355_p13, %p2354_p12 }
  0x44   :  { %p2357_p1 = pnand %p2356_p0, %p2350_p11 }
  0x46   :  { %2360 = shalt.err (!%p2357_p1)
}
  0x47   :  { %59 = dma.hbm_to_vmem [thread:$0]  %s3008_s2, 128, %s57_s30, [#allocation7]  }
  0x48   :  { %s2369_s20 = scalar_lea.vmem %s78_s16, 1536  ;;  %p2374_p3 = scmp.lt.s32.totalorder %s78_s16, %s78_s16 }
  0x49   :  { %p2370_p2 = scmp.ne.s32.totalorder %s78_s16, %s2369_s20  ;;  %p2375_p4 = scmp.lt.s32.totalorder %s2369_s20, %s2369_s20 }
  0x4b   :  { %p2376_p5 = por %p2375_p4, %p2374_p3 }
  0x4d   :  { %p2377_p6 = pnand %p2376_p5, %p2370_p2 }
  0x4f   :  { %2380 = shalt.err (!%p2377_p6)
}
  0x50   :  { %s2464_s0 = smov 192   ;;  %s2465_s21 = smov 12  }
  0x51   :  { %83 = dma.hbm_to_vmem [thread:$0]  %s3011_s5, 1536, %s78_s16, [#allocation10], %s2464_s0, %s2464_s0, %s2465_s21  }
  0x52   :  { %s2466_s24 = smov [#allocation14]   ;;  %s2467_s6 = smov [#allocation17]  }
  0x53   :  { %s103_s14 = sshll.u32 %s2466_s24, 4  ;;  %s129_s27 = sshll.u32 %s2467_s6, 4  ;;  %s104_s14 = int_to_ptr.vmem [resolvable:$true] %s103_s14  ;;  %s130_s27 = int_to_ptr.vmem [resolvable:$true] %s129_s27 }
  0x54   :  { %s2389_s2 = scalar_lea.vmem %s104_s14, 1536  ;;  %p2394_p8 = scmp.lt.s32.totalorder %s104_s14, %s104_s14 }
  0x55   :  { %p2390_p7 = scmp.ne.s32.totalorder %s104_s14, %s2389_s2  ;;  %p2395_p9 = scmp.lt.s32.totalorder %s2389_s2, %s2389_s2 }
  0x57   :  { %p2396_p10 = por %p2395_p9, %p2394_p8 }
  0x59   :  { %p2397_p11 = pnand %p2396_p10, %p2390_p7 }
  0x5b   :  { %2400 = shalt.err (!%p2397_p11)
}
  0x5c   :  { %109 = dma.hbm_to_vmem [thread:$0]  %s3014_s8, 1536, %s104_s14, [#allocation13], %s2456_s1, %s2456_s1, %s2457_s17  }
  0x5d   :  { %s2409_s5 = scalar_lea.vmem %s130_s27, 2048  ;;  %p2414_p13 = scmp.lt.s32.totalorder %s130_s27, %s130_s27 }
  0x5e   :  { %p2410_p12 = scmp.ne.s32.totalorder %s130_s27, %s2409_s5  ;;  %p2415_p0 = scmp.lt.s32.totalorder %s2409_s5, %s2409_s5 }
  0x60   :  { %p2416_p1 = por %p2415_p0, %p2414_p13 }
  0x62   :  { %p2417_p2 = pnand %p2416_p1, %p2410_p12 }
  0x64   :  { %2420 = shalt.err (!%p2417_p2)
}
  0x65   :  { %135 = dma.hbm_to_vmem [thread:$0]  %s3017_s11, 2048, %s130_s27, [#allocation16], %s2460_s25, %s2460_s25, %s2461_s26  }
  0x66   :  { %2441 = dma.done.wait [#allocation4], 512  }
  0x67   :  { %2442 = vsyncadd [#allocation4], 4294966784 }
  0x68   :  { %2443 = dma.done.wait [#allocation7], 192  }
  0x69   :  { %2444 = vsyncadd [#allocation7], 4294967104 }
  0x6a   :  { %2445 = dma.done.wait [#allocation10], 1664  }
  0x6b   :  { %2446 = vsyncadd [#allocation10], 4294965632 }
  0x6c   :  { %2447 = dma.done.wait [#allocation13], 2560  }
  0x6d   :  { %2448 = vsyncadd [#allocation13], 4294964736 }
  0x6e   :  { %2449 = dma.done.wait [#allocation16], 3072  }
  0x6f   :  { %2450 = vsyncadd [#allocation16], 4294964224  ;;  %v2468_v1 = vmov 0.0   ;;  %vm2469_vm0 = vmmov 0   ;;  %v2470_v2 = vmov 0   ;;  %vm220_vm1 = vcmask 523264  }
  0x70   :  { %2025 = vmatprep.subr.bf16.mxu0 %v2468_v1  ;;  %2033 = vmatprep.mubr.msk.bf16.mxu0 %vm2469_vm0, %v2468_v1  ;;  %v2064_v3 = vld [vmem:[#allocation11 + $0x50] ss:$12 sps:$4 sm:$0xff]   ;;  %v2065_v4 = vld [vmem:[#allocation11 + $0x38] ss:$12 sps:$4 sm:$0xff]   ;;  %v2066_v7 = vld [vmem:[#allocation11 + $0x20] ss:$12 sps:$4 sm:$0xff]   ;;  %v434_v28 = vlaneseq }
  0x71   :  { %343 = vmatprep.mubr.bf16.mxu1 %v2470_v2  ;;  %2062 = vset.pattern.permute.xlu1 %v2470_v2  ;;  %v2604_v5 = vld [vmem:[#allocation12 + $0x34] ss:$8 sps:$4 sm:$0xff]   ;;  %v2606_v6 = vld [vmem:[#allocation12 + $0x30] ss:$8 sps:$4 sm:$0xff]   ;;  %v2610_v8 = vld [vmem:[#allocation12 + $0x24] ss:$8 sps:$4 sm:$0xff]  }
  0x72   :  { %2063 = vset.pattern.permute.xlu0 %v2470_v2  ;;  %2026 = vmatpush3.bf16.msra.mxu0 %v2064_v3  ;;  %v2612_v9 = vld [vmem:[#allocation12 + $0x20] ss:$8 sps:$4 sm:$0xff]   ;;  %v2616_v11 = vld [vmem:[#allocation12 + $0x14] ss:$8 sps:$4 sm:$0xff]   ;;  %v2619_v12 = vld [vmem:[#allocation11 + $0x4c] ss:$12 sps:$4 sm:$0xff]  }
  0x73   :  { %2027 = vmatprep.subr.bf16.mxu0 %v2468_v1  ;;  %319 = vmatprep.subr.bf16.mxu1 %v2604_v5  ;;  %v2070_v10 = vld [vmem:[#allocation11 + $0x8] ss:$12 sps:$4 sm:$0xff]   ;;  %v2621_v13 = vld [vmem:[#allocation12 + $0x10] ss:$8 sps:$4 sm:$0xff]   ;;  %v2625_v14 = vld [vmem:[#allocation12 + $0x4] ss:$8 sps:$4 sm:$0xff]  }
  0x74   :  { %320 = vmatpush1.bf16.msra.mxu1 %v2606_v6  ;;  %v195_v15 = vld [vmem:[#allocation3] sm:$0xf]  ;;  %v2627_v16 = vld [vmem:[#allocation11 + $0x48] ss:$12 sps:$4 sm:$0xff]   ;;  %v2632_v18 = vld [vmem:[#allocation9] sm:$0xff]  ;;  %v2684_v33 = vshrl.u32 %v434_v28, 7 }
  0x75   :  { %321 = vmatprep.subr.bf16.mxu1 %v2610_v8  ;;  %v2629_v17 = vld [vmem:[#allocation12] ss:$8 sps:$4 sm:$0xff]   ;;  %v2638_v20 = vld [vmem:[#allocation11 + $0x30] ss:$12 sps:$4 sm:$0xff]   ;;  %v267_v22 = vpack.c.bf16 %v2632_v18, %v2632_v18  ;;  %v2649_v23 = vld [vmem:[#allocation11 + $0x18] ss:$12 sps:$4 sm:$0xff]  }
  0x76   :  { %2028 = vmatpush3.bf16.msra.mxu0 %v2065_v4  ;;  %v2635_v19 = vld [vmem:[#allocation11 + $0x34] ss:$12 sps:$4 sm:$0xff]   ;;  %v2641_v21 = vld [vmem:[#allocation11 + $0x1c] ss:$12 sps:$4 sm:$0xff]   ;;  %v2653_v24 = vld [vmem:[#allocation11 + $0x4] ss:$12 sps:$4 sm:$0xff]  }
  0x77   :  { %2029 = vmatprep.subr.bf16.mxu0 %v2468_v1  ;;  %v2659_v25 = vld [vmem:[#allocation11] ss:$12 sps:$4 sm:$0xff]   ;;  %v2687_v36 = vsub.s32 0, %v2684_v33  ;;  %v440_v46 = vsub.s32 1, %v2684_v33  ;;  %v486_v57 = vld [vmem:[#allocation3 + $0x4] sm:$0xf] }
  0x78   :  { %322 = vmatpush1.bf16.msra.mxu1 %v2612_v9  ;;  %v194_v37 = vld [vmem:[%s3013_s7] sm:$0x3]  ;;  %v2718_v3 = vld [vmem:[#allocation8] sm:$0xff]  ;;  %vm1585_vm9 = vcmask 785408   ;;  %s2471_s18 = smov [#allocation18]   ;;  %vm1882_vm15 = vcmask 57344  }
  0x79   :  { %323 = vmatprep.subr.bf16.mxu1 %v2616_v11  ;;  %v2693_v38 = vrot.slane %v194_v37, %v2687_v36  ;;  %v2699_v48 = vrot.slane %v194_v37, %v440_v46  ;;  %vm468_vm2 = vcmp.gt.s32.totalorder %v2718_v3, 0  ;;  %vm604_vm3 = vcmp.gt.s32.totalorder %v2718_v3, 1 }
  0x7a   :  { %2030 = vmatpush3.bf16.msra.mxu0 %v2066_v7  ;;  %vm737_vm4 = vcmp.gt.s32.totalorder %v2718_v3, 2  ;;  %vm870_vm5 = vcmp.gt.s32.totalorder %v2718_v3, 3  ;;  %vm1003_vm6 = vcmp.gt.s32.totalorder %v2718_v3, 4  ;;  %vm1136_vm7 = vcmp.gt.s32.totalorder %v2718_v3, 5 }
  0x7b   :  { %2031 = vmatprep.subr.bf16.mxu0 %v2468_v1  ;;  %vm1269_vm8 = vcmp.gt.s32.totalorder %v2718_v3, 6  ;;  %vm1402_vm10 = vcmp.gt.s32.totalorder %v2718_v3, 7 }
  0x7c   :  { %324 = vmatpush1.bf16.msra.mxu1 %v2621_v13 }
  0x7d   :  { %325 = vmatprep.subr.bf16.mxu1 %v2625_v14 }
  0x7e   :  { %2032 = vmatpush3.bf16.msra.mxu0 %v2070_v10 }
  0x7f   :  { %400 = vmatprep.subr.bf16.mxu0 %v2619_v12 }
  0x80   :  { %326 = vmatpush1.bf16.msra.mxu1 %v2629_v17 }
  0x81   :  { %2034 = vmatmul.mubr.msk.bf16.vlgmr.msra.gmra.mxu0 %vm220_vm1, %v195_v15  ;;  %499 = vmatprep.subr.bf16.mxu1 %v2604_v5 }
  0x82   :  { %401 = vmatpush1.bf16.msra.mxu0 %v2627_v16  ;;  %424 = vmatprep.mubr.bf16.mxu0 %v2470_v2 }
  0x83   :  { %402 = vmatprep.subr.bf16.mxu0 %v2635_v19  ;;  %1916 = vmatmul.mubr.msk.bf16.vlgmr.msra.gmra.mxu1 %vm220_vm1, %v267_v22 }
  0x84   :  { %500 = vmatpush1.bf16.msra.mxu1 %v2606_v6  ;;  %523 = vmatprep.mubr.bf16.mxu1 %v2470_v2 }
  0x85   :  { %501 = vmatprep.subr.bf16.mxu1 %v2610_v8 }
  0x86   :  { %403 = vmatpush1.bf16.msra.mxu0 %v2638_v20 }
  0x87   :  { %404 = vmatprep.subr.bf16.mxu0 %v2641_v21 }
  0x88   :  { %502 = vmatpush1.bf16.msra.mxu1 %v2612_v9 }
  0x89   :  { %503 = vmatprep.subr.bf16.mxu1 %v2616_v11 }
  0x8a   :  { %405 = vmatpush1.bf16.msra.mxu0 %v2649_v23 }
  0x8b   :  { %406 = vmatprep.subr.bf16.mxu0 %v2653_v24 }
  0x8c   :  { %504 = vmatpush1.bf16.msra.mxu1 %v2621_v13 }
  0x8d   :  { %505 = vmatprep.subr.bf16.mxu1 %v2625_v14 }
  0x8e   :  { %407 = vmatpush1.bf16.msra.mxu0 %v2659_v25 }
  0x8f   :  { %543 = vmatprep.subr.bf16.mxu0 %v2619_v12 }
  0x90   :  { %506 = vmatpush1.bf16.msra.mxu1 %v2629_v17 }
  0x91   :  { %1925 = vmatmul.mubr.msk.bf16.vlgmr.msra.gmra.mxu0 %vm220_vm1, %v195_v15  ;;  %632 = vmatprep.subr.bf16.mxu1 %v2604_v5 }
  0x92   :  { %544 = vmatpush1.bf16.msra.mxu0 %v2627_v16  ;;  %567 = vmatprep.mubr.bf16.mxu0 %v2470_v2 }
  0x93   :  { %545 = vmatprep.subr.bf16.mxu0 %v2635_v19 }
  0x96   :  { %546 = vmatpush1.bf16.msra.mxu0 %v2638_v20 }
  0x97   :  { %547 = vmatprep.subr.bf16.mxu0 %v2641_v21 }
  0x9a   :  { %548 = vmatpush1.bf16.msra.mxu0 %v2649_v23 }
  0x9b   :  { %549 = vmatprep.subr.bf16.mxu0 %v2653_v24 }
  0x9e   :  { %550 = vmatpush1.bf16.msra.mxu0 %v2659_v25 }
  0x9f   :  { %676 = vmatprep.subr.bf16.mxu0 %v2619_v12 }
  0xa1   :  { %1929 = vmatmul.mubr.msk.bf16.vlgmr.msra.gmra.mxu0 %vm220_vm1, %v486_v57 }
  0xa2   :  { %677 = vmatpush1.bf16.msra.mxu0 %v2627_v16  ;;  %700 = vmatprep.mubr.bf16.mxu0 %v2470_v2 }
  0xa3   :  { %678 = vmatprep.subr.bf16.mxu0 %v2635_v19 }
  0xa6   :  { %679 = vmatpush1.bf16.msra.mxu0 %v2638_v20 }
  0xa7   :  { %680 = vmatprep.subr.bf16.mxu0 %v2641_v21 }
  0xaa   :  { %681 = vmatpush1.bf16.msra.mxu0 %v2649_v23 }
  0xab   :  { %682 = vmatprep.subr.bf16.mxu0 %v2653_v24 }
  0xae   :  { %683 = vmatpush1.bf16.msra.mxu0 %v2659_v25 }
  0xaf   :  { %809 = vmatprep.subr.bf16.mxu0 %v2619_v12 }
 0x141   :  { %v2682_v26 = vpop.f32.mrf.mxu0 }
 0x143   :  { %v2035_v27 = vpop.f32.mrf.mxu0  ;;  %v345_v30 = vpop.f32.mrf.mxu1 }
 0x145   :  { %v261_v29 = vpop.f32.mrf.mxu0  ;;  %v347_v32 = vpop.f32.mrf.mxu1 }
 0x147   :  { %v2036_v31 = vpop.f32.mrf.mxu0  ;;  %v349_v34 = vpop.f32.mrf.mxu1 }
 0x149   :  { %v350_v35 = vpop.f32.mrf.mxu1 }
 0x151   :  { %v426_v39 = vpop.f32.mrf.mxu0 }
 0x152   :  { %v427_v40 = vadd.f32 %v426_v39, %v345_v30 }
 0x153   :  { %v428_v41 = vpop.f32.mrf.mxu0 }
 0x154   :  { %v444_v42 = vadd.f32 %v2693_v38, %v427_v40  ;;  %v429_v47 = vadd.f32 %v428_v41, %v347_v32 }
 0x155   :  { %v430_v43 = vpop.f32.mrf.mxu0 }
 0x156   :  { %v1926_v44 = vmul.f32 -1.442695, %v444_v42  ;;  %v445_v49 = vadd.f32 %v2699_v48, %v429_v47 }
 0x157   :  { %v431_v45 = vpop.f32.mrf.mxu0 }
 0x158   :  { %2138 = vpow2.f32 %v1926_v44  ;;  %v1927_v55 = vmul.f32 -1.442695, %v445_v49 }
 0x159   :  { %2140 = vtanh.f32 %v445_v49 }
 0x165   :  { %v2139_v50 = vpop.eup %2138 }
 0x166   :  { %v452_v51 = vadd.f32 1.0, %v2139_v50  ;;  %v2141_v52 = vpop.eup %2140 }
 0x168   :  { %2142 = vrcp.f32 %v452_v51  ;;  %v619_v51 = vld [vmem:[#allocation3 + $0x8] sm:$0xf] }
 0x169   :  { %2144 = vpow2.f32 %v1927_v55  ;;  %1933 = vmatmul.mubr.msk.bf16.vlgmr.msra.gmra.mxu0 %vm220_vm1, %v619_v51  ;;  %v752_v51 = vld [vmem:[#allocation3 + $0xc] sm:$0xf] }
 0x16a   :  { %810 = vmatpush1.bf16.msra.mxu0 %v2627_v16  ;;  %833 = vmatprep.mubr.bf16.mxu0 %v2470_v2 }
 0x16b   :  { %811 = vmatprep.subr.bf16.mxu0 %v2635_v19 }
 0x16e   :  { %812 = vmatpush1.bf16.msra.mxu0 %v2638_v20 }
 0x16f   :  { %813 = vmatprep.subr.bf16.mxu0 %v2641_v21 }
 0x172   :  { %814 = vmatpush1.bf16.msra.mxu0 %v2649_v23 }
 0x173   :  { %815 = vmatprep.subr.bf16.mxu0 %v2653_v24 }
 0x175   :  { %v2143_v53 = vpop.eup %2142 }
 0x176   :  { %v460_v54 = vmul.f32 %v2143_v53, %v2141_v52  ;;  %v2145_v56 = vpop.eup %2144  ;;  %v459_v59 = vmul.f32 %v2143_v53, %v2632_v18  ;;  %816 = vmatpush1.bf16.msra.mxu0 %v2659_v25 }
 0x177   :  { %v453_v58 = vadd.f32 1.0, %v2145_v56  ;;  %942 = vmatprep.subr.bf16.mxu0 %v2619_v12 }
 0x178   :  { %462 = vrot.lane.b32.xlu0 %v460_v54, %s2460_s25 }
 0x179   :  { %2146 = vrcp.f32 %v453_v58  ;;  %1937 = vmatmul.mubr.msk.bf16.vlgmr.msra.gmra.mxu0 %vm220_vm1, %v752_v51 }
 0x17a   :  { %943 = vmatpush1.bf16.msra.mxu0 %v2627_v16  ;;  %966 = vmatprep.mubr.bf16.mxu0 %v2470_v2 }
 0x17b   :  { %944 = vmatprep.subr.bf16.mxu0 %v2635_v19 }
 0x17e   :  { %945 = vmatpush1.bf16.msra.mxu0 %v2638_v20 }
 0x17f   :  { %946 = vmatprep.subr.bf16.mxu0 %v2641_v21 }
 0x182   :  { %947 = vmatpush1.bf16.msra.mxu0 %v2649_v23 }
 0x183   :  { %948 = vmatprep.subr.bf16.mxu0 %v2653_v24 }
 0x186   :  { %v2147_v62 = vpop.eup %2146  ;;  %949 = vmatpush1.bf16.msra.mxu0 %v2659_v25 }
 0x187   :  { %1075 = vmatprep.subr.bf16.mxu0 %v2619_v12 }
 0x1ea   :  { %v463_v60 = vpop.permute.xlu0 %462 }
 0x1eb   :  { %v465_v61 = vadd.f32 %v463_v60, %v459_v59 }
 0x1ed   :  { %2148 = vtanh.f32 %v465_v61  ;;  %475 = vrot.lane.b32.xlu1 %v465_v61, %s2460_s25 }
 0x1f1   :  { %479 = vrot.lane.b32.xlu1 %v2632_v18, %s2460_s25 }
 0x1fa   :  { %v2149_v63 = vpop.eup %2148 }
 0x1fb   :  { %v467_v0 = vmul.f32 %v2149_v63, %v2147_v62  ;;  %v2769_v63 = vmax.f32 %v2682_v26, 0.0 }
 0x1fd   :  { %470 = vrot.lane.b32.xlu0 %v467_v0, %s2460_s25 }
 0x25f   :  { %v476_v4 = vpop.permute.xlu1 %475 }
 0x263   :  { %v480_v7 = vpop.permute.xlu1 %479 }
 0x264   :  { %v2723_v10 = vsel %vm468_vm2, %v476_v4, %v480_v7 }
 0x265   :  { %592 = vrot.lane.b32.xlu0 %v2723_v10, %s2460_s25 }
 0x26f   :  { %v2727_v15 = vpop.permute.xlu0 %470 }
 0x270   :  { %v2733_v22 = vsel %vm468_vm2, %v2727_v15, %v2632_v18  ;;  %v569_v18 = vpop.f32.mrf.mxu0  ;;  %v483_v0 = vmul.f32 %v2727_v15, %v2769_v63 }
 0x271   :  { %v487_v27 = vpack.c.bf16 %v2733_v22, %v2733_v22 }
 0x272   :  { %v571_v28 = vpop.f32.mrf.mxu0 }
 0x273   :  { %1928 = vmatmul.mubr.msk.bf16.vlgmr.msra.gmra.mxu1 %vm220_vm1, %v487_v27 }
 0x274   :  { %633 = vmatpush1.bf16.msra.mxu1 %v2606_v6  ;;  %656 = vmatprep.mubr.bf16.mxu1 %v2470_v2  ;;  %v573_v29 = vpop.f32.mrf.mxu0 }
 0x275   :  { %634 = vmatprep.subr.bf16.mxu1 %v2610_v8 }
 0x276   :  { %v574_v30 = vpop.f32.mrf.mxu0 }
 0x278   :  { %635 = vmatpush1.bf16.msra.mxu1 %v2612_v9  ;;  %v702_v15 = vpop.f32.mrf.mxu0 }
 0x279   :  { %636 = vmatprep.subr.bf16.mxu1 %v2616_v11 }
 0x27c   :  { %637 = vmatpush1.bf16.msra.mxu1 %v2621_v13 }
 0x27d   :  { %638 = vmatprep.subr.bf16.mxu1 %v2625_v14 }
 0x280   :  { %639 = vmatpush1.bf16.msra.mxu1 %v2629_v17 }
 0x281   :  { %765 = vmatprep.subr.bf16.mxu1 %v2604_v5 }
 0x2d7   :  { %v593_v53 = vpop.permute.xlu0 %592 }
 0x333   :  { %v525_v31 = vpop.f32.mrf.mxu1 }
 0x334   :  { %v570_v32 = vadd.f32 %v569_v18, %v525_v31 }
 0x335   :  { %v527_v34 = vpop.f32.mrf.mxu1 }
 0x336   :  { %v576_v35 = vadd.f32 %v570_v32, %v2693_v38  ;;  %v572_v41 = vadd.f32 %v571_v28, %v527_v34 }
 0x337   :  { %v529_v37 = vpop.f32.mrf.mxu1 }
 0x338   :  { %v1930_v39 = vmul.f32 -1.442695, %v576_v35  ;;  %v577_v42 = vadd.f32 %v572_v41, %v2699_v48 }
 0x339   :  { %v530_v40 = vpop.f32.mrf.mxu1 }
 0x33a   :  { %2150 = vpow2.f32 %v1930_v39  ;;  %v1931_v50 = vmul.f32 -1.442695, %v577_v42 }
 0x33b   :  { %2152 = vtanh.f32 %v577_v42 }
 0x347   :  { %v2151_v43 = vpop.eup %2150 }
 0x348   :  { %v584_v44 = vadd.f32 1.0, %v2151_v43  ;;  %v2153_v45 = vpop.eup %2152 }
 0x34a   :  { %2154 = vrcp.f32 %v584_v44 }
 0x34b   :  { %2156 = vpow2.f32 %v1931_v50 }
 0x357   :  { %v2155_v47 = vpop.eup %2154 }
 0x358   :  { %v596_v49 = vmul.f32 %v2155_v47, %v2153_v45  ;;  %v2157_v52 = vpop.eup %2156  ;;  %v595_v55 = vmul.f32 %v2155_v47, %v593_v53 }
 0x359   :  { %v585_v54 = vadd.f32 1.0, %v2157_v52 }
 0x35a   :  { %598 = vrot.lane.b32.xlu1 %v596_v49, %s2460_s25 }
 0x35b   :  { %2158 = vrcp.f32 %v585_v54 }
 0x368   :  { %v2159_v58 = vpop.eup %2158 }
 0x3cc   :  { %v599_v56 = vpop.permute.xlu1 %598 }
 0x3cd   :  { %v601_v57 = vadd.f32 %v599_v56, %v595_v55 }
 0x3cf   :  { %2160 = vtanh.f32 %v601_v57  ;;  %611 = vrot.lane.b32.xlu1 %v601_v57, %s2460_s25 }
 0x3dc   :  { %v2161_v59 = vpop.eup %2160 }
 0x3dd   :  { %v603_v60 = vmul.f32 %v2161_v59, %v2159_v58 }
 0x3df   :  { %606 = vrot.lane.b32.xlu0 %v603_v60, %s2460_s25 }
 0x441   :  { %v612_v61 = vpop.permute.xlu1 %611 }
 0x442   :  { %v2764_v62 = vsel %vm604_vm3, %v612_v61, %v2723_v10  ;;  %v2781_v10 = vsel %vm468_vm2, %v483_v0, -inf }
 0x443   :  { %725 = vrot.lane.b32.xlu0 %v2764_v62, %s2460_s25 }
 0x451   :  { %v607_v4 = vpop.permute.xlu0 %606 }
 0x452   :  { %v2774_v7 = vsel %vm604_vm3, %v607_v4, %v2733_v22  ;;  %v615_v27 = vmul.f32 %v607_v4, %v2769_v63  ;;  %v704_v22 = vpop.f32.mrf.mxu0 }
 0x453   :  { %v620_v18 = vpack.c.bf16 %v2774_v7, %v2774_v7 }
 0x454   :  { %v2783_v28 = vsel %vm604_vm3, %v615_v27, -inf  ;;  %v706_v29 = vpop.f32.mrf.mxu0 }
 0x455   :  { %v617_v26 = vmax.f32 %v2781_v10, %v2783_v28  ;;  %1932 = vmatmul.mubr.msk.bf16.vlgmr.msra.gmra.mxu1 %vm220_vm1, %v620_v18 }
 0x456   :  { %766 = vmatpush1.bf16.msra.mxu1 %v2606_v6  ;;  %789 = vmatprep.mubr.bf16.mxu1 %v2470_v2  ;;  %v707_v30 = vpop.f32.mrf.mxu0 }
 0x457   :  { %767 = vmatprep.subr.bf16.mxu1 %v2610_v8 }
 0x45a   :  { %768 = vmatpush1.bf16.msra.mxu1 %v2612_v9 }
 0x45b   :  { %769 = vmatprep.subr.bf16.mxu1 %v2616_v11 }
 0x45e   :  { %770 = vmatpush1.bf16.msra.mxu1 %v2621_v13 }
 0x45f   :  { %771 = vmatprep.subr.bf16.mxu1 %v2625_v14 }
 0x462   :  { %772 = vmatpush1.bf16.msra.mxu1 %v2629_v17 }
 0x463   :  { %898 = vmatprep.subr.bf16.mxu1 %v2604_v5 }
 0x4b5   :  { %v726_v53 = vpop.permute.xlu0 %725 }
 0x515   :  { %v658_v31 = vpop.f32.mrf.mxu1 }
 0x516   :  { %v703_v32 = vadd.f32 %v702_v15, %v658_v31 }
 0x517   :  { %v660_v34 = vpop.f32.mrf.mxu1 }
 0x518   :  { %v709_v35 = vadd.f32 %v703_v32, %v2693_v38  ;;  %v705_v41 = vadd.f32 %v704_v22, %v660_v34 }
 0x519   :  { %v662_v37 = vpop.f32.mrf.mxu1 }
 0x51a   :  { %v1934_v39 = vmul.f32 -1.442695, %v709_v35  ;;  %v710_v42 = vadd.f32 %v705_v41, %v2699_v48 }
 0x51b   :  { %v663_v40 = vpop.f32.mrf.mxu1 }
 0x51c   :  { %2162 = vpow2.f32 %v1934_v39  ;;  %v1935_v50 = vmul.f32 -1.442695, %v710_v42 }
 0x51d   :  { %2164 = vtanh.f32 %v710_v42 }
 0x529   :  { %v2163_v43 = vpop.eup %2162 }
 0x52a   :  { %v717_v44 = vadd.f32 1.0, %v2163_v43  ;;  %v2165_v45 = vpop.eup %2164 }
 0x52c   :  { %2166 = vrcp.f32 %v717_v44 }
 0x52d   :  { %2168 = vpow2.f32 %v1935_v50 }
 0x539   :  { %v2167_v47 = vpop.eup %2166 }
 0x53a   :  { %v729_v49 = vmul.f32 %v2167_v47, %v2165_v45  ;;  %v2169_v52 = vpop.eup %2168  ;;  %v728_v55 = vmul.f32 %v2167_v47, %v726_v53 }
 0x53b   :  { %v718_v54 = vadd.f32 1.0, %v2169_v52 }
 0x53c   :  { %731 = vrot.lane.b32.xlu1 %v729_v49, %s2460_s25  ;;  %v885_v49 = vld [vmem:[#allocation3 + $0x10] sm:$0xf] }
 0x53d   :  { %2170 = vrcp.f32 %v718_v54  ;;  %1941 = vmatmul.mubr.msk.bf16.vlgmr.msra.gmra.mxu0 %vm220_vm1, %v885_v49 }
 0x53e   :  { %1076 = vmatpush1.bf16.msra.mxu0 %v2627_v16  ;;  %1099 = vmatprep.mubr.bf16.mxu0 %v2470_v2 }
 0x53f   :  { %1077 = vmatprep.subr.bf16.mxu0 %v2635_v19 }
 0x542   :  { %1078 = vmatpush1.bf16.msra.mxu0 %v2638_v20 }
 0x543   :  { %1079 = vmatprep.subr.bf16.mxu0 %v2641_v21 }
 0x546   :  { %1080 = vmatpush1.bf16.msra.mxu0 %v2649_v23 }
 0x547   :  { %1081 = vmatprep.subr.bf16.mxu0 %v2653_v24 }
 0x54a   :  { %v2171_v58 = vpop.eup %2170  ;;  %1082 = vmatpush1.bf16.msra.mxu0 %v2659_v25 }
 0x54b   :  { %1208 = vmatprep.subr.bf16.mxu0 %v2619_v12 }
 0x5ae   :  { %v732_v56 = vpop.permute.xlu1 %731 }
 0x5af   :  { %v734_v57 = vadd.f32 %v732_v56, %v728_v55 }
 0x5b1   :  { %2172 = vtanh.f32 %v734_v57  ;;  %744 = vrot.lane.b32.xlu1 %v734_v57, %s2460_s25 }
 0x5be   :  { %v2173_v59 = vpop.eup %2172 }
 0x5bf   :  { %v736_v60 = vmul.f32 %v2173_v59, %v2171_v58 }
 0x5c1   :  { %739 = vrot.lane.b32.xlu0 %v736_v60, %s2460_s25 }
 0x623   :  { %v745_v61 = vpop.permute.xlu1 %744 }
 0x624   :  { %v2814_v0 = vsel %vm737_vm4, %v745_v61, %v2764_v62  ;;  %v835_v62 = vpop.f32.mrf.mxu0 }
 0x625   :  { %858 = vrot.lane.b32.xlu0 %v2814_v0, %s2460_s25 }
 0x633   :  { %v740_v4 = vpop.permute.xlu0 %739 }
 0x634   :  { %v2819_v27 = vsel %vm737_vm4, %v740_v4, %v2774_v7  ;;  %v748_v18 = vmul.f32 %v740_v4, %v2769_v63  ;;  %v837_v7 = vpop.f32.mrf.mxu0 }
 0x635   :  { %v753_v15 = vpack.c.bf16 %v2819_v27, %v2819_v27 }
 0x636   :  { %v749_v22 = vsel %vm737_vm4, %v748_v18, -inf  ;;  %v839_v10 = vpop.f32.mrf.mxu0 }
 0x637   :  { %v2827_v29 = vmax.f32 %v617_v26, %v749_v22  ;;  %1936 = vmatmul.mubr.msk.bf16.vlgmr.msra.gmra.mxu1 %vm220_vm1, %v753_v15 }
 0x638   :  { %899 = vmatpush1.bf16.msra.mxu1 %v2606_v6  ;;  %922 = vmatprep.mubr.bf16.mxu1 %v2470_v2  ;;  %v840_v28 = vpop.f32.mrf.mxu0 }
 0x639   :  { %900 = vmatprep.subr.bf16.mxu1 %v2610_v8 }
 0x63c   :  { %901 = vmatpush1.bf16.msra.mxu1 %v2612_v9 }
 0x63d   :  { %902 = vmatprep.subr.bf16.mxu1 %v2616_v11 }
 0x640   :  { %903 = vmatpush1.bf16.msra.mxu1 %v2621_v13 }
 0x641   :  { %904 = vmatprep.subr.bf16.mxu1 %v2625_v14 }
 0x644   :  { %905 = vmatpush1.bf16.msra.mxu1 %v2629_v17 }
 0x645   :  { %1031 = vmatprep.subr.bf16.mxu1 %v2604_v5 }
 0x697   :  { %v859_v51 = vpop.permute.xlu0 %858 }
 0x6f7   :  { %v791_v26 = vpop.f32.mrf.mxu1 }
 0x6f8   :  { %v836_v30 = vadd.f32 %v835_v62, %v791_v26 }
 0x6f9   :  { %v793_v31 = vpop.f32.mrf.mxu1 }
 0x6fa   :  { %v842_v32 = vadd.f32 %v836_v30, %v2693_v38  ;;  %v838_v39 = vadd.f32 %v837_v7, %v793_v31 }
 0x6fb   :  { %v795_v34 = vpop.f32.mrf.mxu1 }
 0x6fc   :  { %v1938_v35 = vmul.f32 -1.442695, %v842_v32  ;;  %v843_v40 = vadd.f32 %v838_v39, %v2699_v48 }
 0x6fd   :  { %v796_v37 = vpop.f32.mrf.mxu1 }
 0x6fe   :  { %2174 = vpow2.f32 %v1938_v35  ;;  %v1939_v47 = vmul.f32 -1.442695, %v843_v40 }
 0x6ff   :  { %2176 = vtanh.f32 %v843_v40 }
 0x70b   :  { %v2175_v41 = vpop.eup %2174 }
 0x70c   :  { %v850_v42 = vadd.f32 1.0, %v2175_v41  ;;  %v2177_v43 = vpop.eup %2176 }
 0x70e   :  { %2178 = vrcp.f32 %v850_v42 }
 0x70f   :  { %2180 = vpow2.f32 %v1939_v47  ;;  %v1018_v47 = vld [vmem:[#allocation3 + $0x14] sm:$0xf] }
 0x710   :  { %1945 = vmatmul.mubr.msk.bf16.vlgmr.msra.gmra.mxu0 %vm220_vm1, %v1018_v47  ;;  %v2234_v47 = vld [vmem:[#allocation12 + $0x30] ss:$8 sps:$4 sm:$0xff]  }
 0x711   :  { %1209 = vmatpush1.bf16.msra.mxu0 %v2627_v16  ;;  %1232 = vmatprep.mubr.bf16.mxu0 %v2470_v2 }
 0x712   :  { %1210 = vmatprep.subr.bf16.mxu0 %v2635_v19 }
 0x715   :  { %1211 = vmatpush1.bf16.msra.mxu0 %v2638_v20 }
 0x716   :  { %1212 = vmatprep.subr.bf16.mxu0 %v2641_v21 }
 0x719   :  { %1213 = vmatpush1.bf16.msra.mxu0 %v2649_v23 }
 0x71a   :  { %1214 = vmatprep.subr.bf16.mxu0 %v2653_v24 }
 0x71b   :  { %v2179_v44 = vpop.eup %2178 }
 0x71c   :  { %v862_v45 = vmul.f32 %v2179_v44, %v2177_v43  ;;  %v2181_v50 = vpop.eup %2180  ;;  %v861_v53 = vmul.f32 %v2179_v44, %v859_v51 }
 0x71d   :  { %v851_v52 = vadd.f32 1.0, %v2181_v50  ;;  %1215 = vmatpush1.bf16.msra.mxu0 %v2659_v25 }
 0x71e   :  { %864 = vrot.lane.b32.xlu1 %v862_v45, %s2460_s25  ;;  %1341 = vmatprep.subr.bf16.mxu0 %v2619_v12 }
 0x71f   :  { %2182 = vrcp.f32 %v851_v52 }
 0x72c   :  { %v2183_v56 = vpop.eup %2182 }
 0x790   :  { %v865_v54 = vpop.permute.xlu1 %864 }
 0x791   :  { %v867_v55 = vadd.f32 %v865_v54, %v861_v53 }
 0x793   :  { %2184 = vtanh.f32 %v867_v55  ;;  %877 = vrot.lane.b32.xlu1 %v867_v55, %s2460_s25 }
 0x7a0   :  { %v2185_v57 = vpop.eup %2184 }
 0x7a1   :  { %v869_v58 = vmul.f32 %v2185_v57, %v2183_v56 }
 0x7a3   :  { %872 = vrot.lane.b32.xlu0 %v869_v58, %s2460_s25 }
 0x805   :  { %v878_v59 = vpop.permute.xlu1 %877 }
 0x806   :  { %v2856_v60 = vsel %vm870_vm5, %v878_v59, %v2814_v0  ;;  %v968_v0 = vpop.f32.mrf.mxu0 }
 0x807   :  { %991 = vrot.lane.b32.xlu0 %v2856_v60, %s2460_s25 }
 0x815   :  { %v873_v61 = vpop.permute.xlu0 %872 }
 0x816   :  { %v2861_v4 = vsel %vm870_vm5, %v873_v61, %v2819_v27  ;;  %v881_v18 = vmul.f32 %v873_v61, %v2769_v63  ;;  %v970_v27 = vpop.f32.mrf.mxu0 }
 0x817   :  { %v886_v15 = vpack.c.bf16 %v2861_v4, %v2861_v4 }
 0x818   :  { %v2866_v22 = vsel %vm870_vm5, %v881_v18, -inf  ;;  %v972_v7 = vpop.f32.mrf.mxu0 }
 0x819   :  { %v883_v62 = vmax.f32 %v2827_v29, %v2866_v22  ;;  %1940 = vmatmul.mubr.msk.bf16.vlgmr.msra.gmra.mxu1 %vm220_vm1, %v886_v15 }
 0x81a   :  { %1032 = vmatpush1.bf16.msra.mxu1 %v2606_v6  ;;  %1055 = vmatprep.mubr.bf16.mxu1 %v2470_v2  ;;  %v973_v10 = vpop.f32.mrf.mxu0 }
 0x81b   :  { %1033 = vmatprep.subr.bf16.mxu1 %v2610_v8 }
 0x81c   :  { %v1101_v29 = vpop.f32.mrf.mxu0 }
 0x81e   :  { %1034 = vmatpush1.bf16.msra.mxu1 %v2612_v9 }
 0x81f   :  { %1035 = vmatprep.subr.bf16.mxu1 %v2616_v11 }
 0x822   :  { %1036 = vmatpush1.bf16.msra.mxu1 %v2621_v13 }
 0x823   :  { %1037 = vmatprep.subr.bf16.mxu1 %v2625_v14 }
 0x826   :  { %1038 = vmatpush1.bf16.msra.mxu1 %v2629_v17 }
 0x827   :  { %1164 = vmatprep.subr.bf16.mxu1 %v2604_v5 }
 0x879   :  { %v992_v50 = vpop.permute.xlu0 %991 }
 0x8d9   :  { %v924_v28 = vpop.f32.mrf.mxu1 }
 0x8da   :  { %v969_v26 = vadd.f32 %v968_v0, %v924_v28 }
 0x8db   :  { %v926_v30 = vpop.f32.mrf.mxu1 }
 0x8dc   :  { %v975_v31 = vadd.f32 %v969_v26, %v2693_v38  ;;  %v971_v37 = vadd.f32 %v970_v27, %v926_v30 }
 0x8dd   :  { %v928_v32 = vpop.f32.mrf.mxu1 }
 0x8de   :  { %v1942_v34 = vmul.f32 -1.442695, %v975_v31  ;;  %v976_v39 = vadd.f32 %v971_v37, %v2699_v48  ;;  %v1151_v32 = vld [vmem:[#allocation3 + $0x18] sm:$0xf] }
 0x8df   :  { %v929_v35 = vpop.f32.mrf.mxu1  ;;  %1949 = vmatmul.mubr.msk.bf16.vlgmr.msra.gmra.mxu0 %vm220_vm1, %v1151_v32 }
 0x8e0   :  { %2186 = vpow2.f32 %v1942_v34  ;;  %v1943_v45 = vmul.f32 -1.442695, %v976_v39  ;;  %1342 = vmatpush1.bf16.msra.mxu0 %v2627_v16  ;;  %1365 = vmatprep.mubr.bf16.mxu0 %v2470_v2 }
 0x8e1   :  { %2188 = vtanh.f32 %v976_v39  ;;  %1343 = vmatprep.subr.bf16.mxu0 %v2635_v19 }
 0x8e4   :  { %1344 = vmatpush1.bf16.msra.mxu0 %v2638_v20 }
 0x8e5   :  { %1345 = vmatprep.subr.bf16.mxu0 %v2641_v21 }
 0x8e8   :  { %1346 = vmatpush1.bf16.msra.mxu0 %v2649_v23 }
 0x8e9   :  { %1347 = vmatprep.subr.bf16.mxu0 %v2653_v24 }
 0x8ec   :  { %1348 = vmatpush1.bf16.msra.mxu0 %v2659_v25 }
 0x8ed   :  { %v2187_v40 = vpop.eup %2186 }
 0x8ee   :  { %v983_v41 = vadd.f32 1.0, %v2187_v40  ;;  %v2189_v42 = vpop.eup %2188 }
 0x8f0   :  { %2190 = vrcp.f32 %v983_v41 }
 0x8f1   :  { %2192 = vpow2.f32 %v1943_v45 }
 0x8fd   :  { %v2191_v43 = vpop.eup %2190 }
 0x8fe   :  { %v995_v44 = vmul.f32 %v2191_v43, %v2189_v42  ;;  %v2193_v49 = vpop.eup %2192  ;;  %v994_v52 = vmul.f32 %v2191_v43, %v992_v50  ;;  %v2236_v50 = vld [vmem:[#allocation12 + $0x20] ss:$8 sps:$4 sm:$0xff]  }
 0x8ff   :  { %v984_v51 = vadd.f32 1.0, %v2193_v49  ;;  %v2235_v49 = vld [vmem:[#allocation12 + $0x24] ss:$8 sps:$4 sm:$0xff]  }
 0x900   :  { %997 = vrot.lane.b32.xlu1 %v995_v44, %s2460_s25 }
 0x901   :  { %2194 = vrcp.f32 %v984_v51  ;;  %v2237_v51 = vld [vmem:[#allocation12 + $0x14] ss:$8 sps:$4 sm:$0xff]  }
 0x90e   :  { %v2195_v55 = vpop.eup %2194 }
 0x972   :  { %v998_v53 = vpop.permute.xlu1 %997 }
 0x973   :  { %v1000_v54 = vadd.f32 %v998_v53, %v994_v52  ;;  %v2238_v52 = vld [vmem:[#allocation12 + $0x10] ss:$8 sps:$4 sm:$0xff]   ;;  %v2239_v53 = vld [vmem:[#allocation12 + $0x4] ss:$8 sps:$4 sm:$0xff]  }
 0x975   :  { %2196 = vtanh.f32 %v1000_v54  ;;  %1010 = vrot.lane.b32.xlu1 %v1000_v54, %s2460_s25  ;;  %v2240_v54 = vld [vmem:[#allocation12] ss:$8 sps:$4 sm:$0xff]  }
 0x982   :  { %v2197_v56 = vpop.eup %2196 }
 0x983   :  { %v1002_v57 = vmul.f32 %v2197_v56, %v2195_v55 }
 0x985   :  { %1005 = vrot.lane.b32.xlu0 %v1002_v57, %s2460_s25 }
 0x9e7   :  { %v1011_v58 = vpop.permute.xlu1 %1010 }
 0x9e8   :  { %v2897_v59 = vsel %vm1003_vm6, %v1011_v58, %v2856_v60  ;;  %v1103_v60 = vpop.f32.mrf.mxu0 }
 0x9e9   :  { %1124 = vrot.lane.b32.xlu0 %v2897_v59, %s2460_s25 }
 0x9f7   :  { %v1006_v61 = vpop.permute.xlu0 %1005 }
 0x9f8   :  { %v2902_v18 = vsel %vm1003_vm6, %v1006_v61, %v2861_v4  ;;  %v1014_v12 = vmul.f32 %v1006_v61, %v2769_v63  ;;  %v1105_v4 = vpop.f32.mrf.mxu0 }
 0x9f9   :  { %v1019_v15 = vpack.c.bf16 %v2902_v18, %v2902_v18 }
 0x9fa   :  { %v1015_v0 = vsel %vm1003_vm6, %v1014_v12, -inf }
 0x9fb   :  { %v2910_v27 = vmax.f32 %v883_v62, %v1015_v0  ;;  %1944 = vmatmul.mubr.msk.bf16.vlgmr.msra.gmra.mxu1 %vm220_vm1, %v1019_v15 }
 0x9fc   :  { %1165 = vmatpush1.bf16.msra.mxu1 %v2606_v6  ;;  %1188 = vmatprep.mubr.bf16.mxu1 %v2470_v2  ;;  %v1106_v6 = vpop.f32.mrf.mxu0 }
 0x9fd   :  { %1166 = vmatprep.subr.bf16.mxu1 %v2610_v8 }
 0x9fe   :  { %v1234_v55 = vpop.f32.mrf.mxu0 }
 0xa00   :  { %1167 = vmatpush1.bf16.msra.mxu1 %v2612_v9  ;;  %v1236_v56 = vpop.f32.mrf.mxu0 }
 0xa01   :  { %1168 = vmatprep.subr.bf16.mxu1 %v2616_v11 }
 0xa02   :  { %v1238_v57 = vpop.f32.mrf.mxu0 }
 0xa03   :  { %v2095_v57 = vld [vmem:[#allocation14 + $0x40] ss:$8 sps:$4 sm:$0xff]  }
 0xa04   :  { %1169 = vmatpush1.bf16.msra.mxu1 %v2621_v13  ;;  %v1239_v58 = vpop.f32.mrf.mxu0 }
 0xa05   :  { %1170 = vmatprep.subr.bf16.mxu1 %v2625_v14  ;;  %v2106_v58 = vld [vmem:[#allocation15 + $0x34] ss:$8 sps:$4 sm:$0xff]  }
 0xa08   :  { %1171 = vmatpush1.bf16.msra.mxu1 %v2629_v17 }
 0xa09   :  { %1297 = vmatprep.subr.bf16.mxu1 %v2604_v5 }
 0xa5b   :  { %v1125_v35 = vpop.permute.xlu0 %1124 }
 0xabb   :  { %v1057_v22 = vpop.f32.mrf.mxu1 }
 0xabc   :  { %v1102_v62 = vadd.f32 %v1101_v29, %v1057_v22 }
 0xabd   :  { %v1059_v7 = vpop.f32.mrf.mxu1 }
 0xabe   :  { %v1108_v8 = vadd.f32 %v1102_v62, %v2693_v38  ;;  %v1104_v13 = vadd.f32 %v1103_v60, %v1059_v7 }
 0xabf   :  { %v1061_v9 = vpop.f32.mrf.mxu1 }
 0xac0   :  { %v1946_v10 = vmul.f32 -1.442695, %v1108_v8  ;;  %v1109_v14 = vadd.f32 %v1104_v13, %v2699_v48 }
 0xac1   :  { %v1062_v11 = vpop.f32.mrf.mxu1 }
 0xac2   :  { %2198 = vpow2.f32 %v1946_v10  ;;  %v1947_v31 = vmul.f32 -1.442695, %v1109_v14  ;;  %v1284_v10 = vld [vmem:[#allocation3 + $0x1c] sm:$0xf] }
 0xac3   :  { %2200 = vtanh.f32 %v1109_v14  ;;  %1953 = vmatmul.mubr.msk.bf16.vlgmr.msra.gmra.mxu0 %vm220_vm1, %v1284_v10  ;;  %v2113_v10 = vld [vmem:[#allocation14] ss:$8 sps:$4 sm:$0xff]  }
 0xac4   :  { %1621 = vmatprep.mubr.bf16.mxu0 %v2470_v2 }
 0xacf   :  { %v2199_v28 = vpop.eup %2198 }
 0xad0   :  { %v1116_v17 = vadd.f32 1.0, %v2199_v28  ;;  %v2201_v5 = vpop.eup %2200 }
 0xad2   :  { %2202 = vrcp.f32 %v1116_v17 }
 0xad3   :  { %2204 = vpow2.f32 %v1947_v31 }
 0xadf   :  { %v2203_v26 = vpop.eup %2202 }
 0xae0   :  { %v1128_v30 = vmul.f32 %v2203_v26, %v2201_v5  ;;  %v2205_v34 = vpop.eup %2204  ;;  %v1127_v39 = vmul.f32 %v2203_v26, %v1125_v35 }
 0xae1   :  { %v1117_v37 = vadd.f32 1.0, %v2205_v34 }
 0xae2   :  { %1130 = vrot.lane.b32.xlu1 %v1128_v30, %s2460_s25 }
 0xae3   :  { %2206 = vrcp.f32 %v1117_v37 }
 0xaf0   :  { %v2207_v16 = vpop.eup %2206 }
 0xb54   :  { %v1131_v40 = vpop.permute.xlu1 %1130 }
 0xb55   :  { %v1133_v41 = vadd.f32 %v1131_v40, %v1127_v39 }
 0xb57   :  { %2208 = vtanh.f32 %v1133_v41  ;;  %1143 = vrot.lane.b32.xlu1 %v1133_v41, %s2460_s25 }
 0xb64   :  { %v2209_v19 = vpop.eup %2208 }
 0xb65   :  { %v1135_v20 = vmul.f32 %v2209_v19, %v2207_v16 }
 0xb67   :  { %1138 = vrot.lane.b32.xlu0 %v1135_v20, %s2460_s25 }
 0xb83   :  { %v1367_v19 = vpop.f32.mrf.mxu0 }
 0xb85   :  { %v1369_v20 = vpop.f32.mrf.mxu0 }
 0xbc9   :  { %v1144_v21 = vpop.permute.xlu1 %1143 }
 0xbca   :  { %v2938_v42 = vsel %vm1136_vm7, %v1144_v21, %v2897_v59  ;;  %v1371_v21 = vpop.f32.mrf.mxu0 }
 0xbcb   :  { %1257 = vrot.lane.b32.xlu0 %v2938_v42, %s2460_s25  ;;  %v2124_v21 = vld [vmem:[#allocation17 + $0x70] sm:$0xff]  }
 0xbd9   :  { %v1139_v23 = vpop.permute.xlu0 %1138 }
 0xbda   :  { %v2943_v24 = vsel %vm1136_vm7, %v1139_v23, %v2902_v18  ;;  %v1147_v25 = vmul.f32 %v1139_v23, %v2769_v63 }
 0xbdb   :  { %v1152_v43 = vpack.c.bf16 %v2943_v24, %v2943_v24 }
 0xbdc   :  { %v2948_v44 = vsel %vm1136_vm7, %v1147_v25, -inf }
 0xbdd   :  { %v1149_v45 = vmax.f32 %v2910_v27, %v2948_v44  ;;  %1948 = vmatmul.mubr.msk.bf16.vlgmr.msra.gmra.mxu1 %vm220_vm1, %v1152_v43 }
 0xbde   :  { %1298 = vmatpush1.bf16.msra.mxu1 %v2234_v47  ;;  %1321 = vmatprep.mubr.bf16.mxu1 %v2470_v2 }
 0xbdf   :  { %1299 = vmatprep.subr.bf16.mxu1 %v2235_v49 }
 0xbe2   :  { %1300 = vmatpush1.bf16.msra.mxu1 %v2236_v50 }
 0xbe3   :  { %1301 = vmatprep.subr.bf16.mxu1 %v2237_v51 }
 0xbe6   :  { %1302 = vmatpush1.bf16.msra.mxu1 %v2238_v52 }
 0xbe7   :  { %1303 = vmatprep.subr.bf16.mxu1 %v2239_v53 }
 0xbea   :  { %1304 = vmatpush1.bf16.msra.mxu1 %v2240_v54  ;;  %v2092_v54 = vld [vmem:[#allocation14 + $0x50] ss:$8 sps:$4 sm:$0xff]  }
 0xbeb   :  { %1492 = vmatprep.subr.bf16.mxu1 %v2106_v58 }
 0xc3d   :  { %v1258_v13 = vpop.permute.xlu0 %1257 }
 0xc9d   :  { %v1190_v59 = vpop.f32.mrf.mxu1 }
 0xc9e   :  { %v1235_v61 = vadd.f32 %v1234_v55, %v1190_v59  ;;  %v2094_v55 = vld [vmem:[#allocation14 + $0x54] ss:$8 sps:$4 sm:$0xff]  }
 0xc9f   :  { %v1192_v18 = vpop.f32.mrf.mxu1  ;;  %1593 = vmatprep.subr.bf16.mxu0 %v2094_v55  ;;  %v2100_v59 = vld [vmem:[#allocation14 + $0x34] ss:$8 sps:$4 sm:$0xff]  }
 0xca0   :  { %v1241_v12 = vadd.f32 %v1235_v61, %v2693_v38  ;;  %v1237_v60 = vadd.f32 %v1236_v56, %v1192_v18  ;;  %v2097_v56 = vld [vmem:[#allocation14 + $0x44] ss:$8 sps:$4 sm:$0xff]   ;;  %1594 = vmatpush1.bf16.msra.mxu0 %v2092_v54  ;;  %v2110_v61 = vld [vmem:[#allocation15 + $0x20] ss:$8 sps:$4 sm:$0xff]   ;;  %v2098_v18 = vld [vmem:[#allocation14 + $0x30] ss:$8 sps:$4 sm:$0xff]  }
 0xca1   :  { %v1194_v15 = vpop.f32.mrf.mxu1  ;;  %1595 = vmatprep.subr.bf16.mxu0 %v2097_v56 }
 0xca2   :  { %v1950_v0 = vmul.f32 -1.442695, %v1241_v12  ;;  %v1242_v4 = vadd.f32 %v1237_v60, %v2699_v48  ;;  %v2103_v12 = vld [vmem:[#allocation14 + $0x24] ss:$8 sps:$4 sm:$0xff]   ;;  %v2101_v15 = vld [vmem:[#allocation14 + $0x20] ss:$8 sps:$4 sm:$0xff]  }
 0xca3   :  { %v1195_v29 = vpop.f32.mrf.mxu1 }
 0xca4   :  { %2210 = vpow2.f32 %v1950_v0  ;;  %v1951_v9 = vmul.f32 -1.442695, %v1242_v4  ;;  %1596 = vmatpush1.bf16.msra.mxu0 %v2095_v57  ;;  %v2109_v0 = vld [vmem:[#allocation14 + $0x14] ss:$8 sps:$4 sm:$0xff]   ;;  %v2107_v29 = vld [vmem:[#allocation14 + $0x10] ss:$8 sps:$4 sm:$0xff]  }
 0xca5   :  { %2212 = vtanh.f32 %v1242_v4  ;;  %1597 = vmatprep.subr.bf16.mxu0 %v2100_v59 }
 0xca8   :  { %1598 = vmatpush1.bf16.msra.mxu0 %v2098_v18 }
 0xca9   :  { %1599 = vmatprep.subr.bf16.mxu0 %v2103_v12 }
 0xcac   :  { %1600 = vmatpush1.bf16.msra.mxu0 %v2101_v15 }
 0xcad   :  { %1601 = vmatprep.subr.bf16.mxu0 %v2109_v0 }
 0xcb0   :  { %1602 = vmatpush1.bf16.msra.mxu0 %v2107_v29 }
 0xcb1   :  { %v2211_v6 = vpop.eup %2210 }
 0xcb2   :  { %v1249_v22 = vadd.f32 1.0, %v2211_v6  ;;  %v2213_v62 = vpop.eup %2212 }
 0xcb4   :  { %2214 = vrcp.f32 %v1249_v22 }
 0xcb5   :  { %2216 = vpow2.f32 %v1951_v9  ;;  %v2115_v9 = vld [vmem:[#allocation14 + $0x4] ss:$8 sps:$4 sm:$0xff]  }
 0xcb6   :  { %1603 = vmatprep.subr.bf16.mxu0 %v2115_v9 }
 0xcb7   :  { %1604 = vmatpush1.bf16.msra.mxu0 %v2113_v10 }
 0xcb8   :  { %2037 = vmatprep.subr.bf16.mxu0 %v2468_v1 }
 0xcc1   :  { %v2215_v7 = vpop.eup %2214 }
 0xcc2   :  { %v1261_v8 = vmul.f32 %v2215_v7, %v2213_v62  ;;  %v2217_v11 = vpop.eup %2216  ;;  %v1260_v28 = vmul.f32 %v2215_v7, %v1258_v13  ;;  %v2116_v13 = vld [vmem:[#allocation15 + $0x10] ss:$8 sps:$4 sm:$0xff]  }
 0xcc3   :  { %v1250_v14 = vadd.f32 1.0, %v2217_v11  ;;  %v2118_v11 = vld [vmem:[#allocation15 + $0x14] ss:$8 sps:$4 sm:$0xff]  }
 0xcc4   :  { %1263 = vrot.lane.b32.xlu1 %v1261_v8, %s2460_s25 }
 0xcc5   :  { %2218 = vrcp.f32 %v1250_v14  ;;  %v1419_v14 = vld [vmem:[#allocation6] sm:$0xf] }
 0xcc6   :  { %1978 = vmatmul.mubr.msk.bf16.vlgmr.msra.gmra.mxu0 %vm1585_vm9, %v1419_v14  ;;  %v1830_v14 = vld [vmem:[%s3019_s13] sm:$0x1] }
 0xcc7   :  { %2039 = vmatprep.mubr.msk.bf16.mxu0 %vm2469_vm0, %v2468_v1 }
 0xcd2   :  { %v2219_v26 = vpop.eup %2218 }
 0xd36   :  { %v1264_v17 = vpop.permute.xlu1 %1263 }
 0xd37   :  { %v1266_v5 = vadd.f32 %v1264_v17, %v1260_v28  ;;  %v2121_v28 = vld [vmem:[#allocation15 + $0x4] ss:$8 sps:$4 sm:$0xff]   ;;  %v2119_v17 = vld [vmem:[#allocation15] ss:$8 sps:$4 sm:$0xff]  }
 0xd39   :  { %2220 = vtanh.f32 %v1266_v5  ;;  %1276 = vrot.lane.b32.xlu1 %v1266_v5, %s2460_s25 }
 0xd46   :  { %v2221_v30 = vpop.eup %2220 }
 0xd47   :  { %v1268_v31 = vmul.f32 %v2221_v30, %v2219_v26 }
 0xd49   :  { %1271 = vrot.lane.b32.xlu0 %v1268_v31, %s2460_s25  ;;  %v2122_v31 = vld [vmem:[#allocation17 + $0x78] sm:$0xff]  }
 0xdab   :  { %v1277_v32 = vpop.permute.xlu1 %1276 }
 0xdac   :  { %v1279_v34 = vsel %vm1269_vm8, %v1277_v32, %v2938_v42  ;;  %v1372_v42 = vpop.f32.mrf.mxu0 }
 0xdad   :  { %1390 = vrot.lane.b32.xlu0 %v1279_v34, %s2460_s25  ;;  %v2126_v42 = vld [vmem:[#allocation17 + $0x68] sm:$0xff]  }
 0xdbb   :  { %v1272_v35 = vpop.permute.xlu0 %1271 }
 0xdbc   :  { %v1274_v37 = vsel %vm1269_vm8, %v1272_v35, %v2943_v24  ;;  %v1280_v39 = vmul.f32 %v1272_v35, %v2769_v63  ;;  %v1956_v35 = vld [vmem:[%s3010_s4] ss:$0 sm:$0xff] }
 0xdbd   :  { %v1285_v40 = vpack.c.bf16 %v1274_v37, %v1274_v37  ;;  %vm1415_vm11 = vcmp.lt.s32.totalorder %v2718_v3, %v1956_v35  ;;  %v2131_v3 = vld [vmem:[#allocation17 + $0x18] sm:$0xff]  }
 0xdbe   :  { %v1281_v41 = vsel %vm1269_vm8, %v1280_v39, -inf }
 0xdbf   :  { %v2969_v16 = vmax.f32 %v1149_v45, %v1281_v41  ;;  %1952 = vmatmul.mubr.msk.bf16.vlgmr.msra.gmra.mxu1 %vm220_vm1, %v1285_v40 }
 0xdc0   :  { %1516 = vmatprep.mubr.bf16.mxu1 %v2470_v2 }
 0xe1f   :  { %v1391_v6 = vpop.permute.xlu0 %1390 }
 0xe7f   :  { %v1323_v23 = vpop.f32.mrf.mxu1 }
 0xe80   :  { %v1368_v25 = vadd.f32 %v1367_v19, %v1323_v23  ;;  %v2123_v19 = vld [vmem:[#allocation17 + $0x38] sm:$0xff]   ;;  %v2127_v23 = vld [vmem:[#allocation17 + $0x28] sm:$0xff]  }
 0xe81   :  { %v1325_v24 = vpop.f32.mrf.mxu1 }
 0xe82   :  { %v1374_v43 = vadd.f32 %v1368_v25, %v2693_v38  ;;  %v1370_v27 = vadd.f32 %v1369_v20, %v1325_v24  ;;  %v2104_v38 = vld [vmem:[#allocation15 + $0x30] ss:$8 sps:$4 sm:$0xff]   ;;  %v2129_v25 = vld [vmem:[#allocation17 + $0x20] sm:$0xff]  }
 0xe83   :  { %v1327_v47 = vpop.f32.mrf.mxu1  ;;  %1493 = vmatpush1.bf16.msra.mxu1 %v2104_v38  ;;  %v2130_v24 = vld [vmem:[#allocation17 + $0x58] sm:$0xff]  }
 0xe84   :  { %v1954_v49 = vmul.f32 -1.442695, %v1374_v43  ;;  %v1375_v44 = vadd.f32 %v1370_v27, %v2699_v48  ;;  %v2112_v48 = vld [vmem:[#allocation15 + $0x24] ss:$8 sps:$4 sm:$0xff]   ;;  %v1623_v43 = vpop.f32.mrf.mxu0 }
 0xe85   :  { %v1328_v50 = vpop.f32.mrf.mxu1  ;;  %1494 = vmatprep.subr.bf16.mxu1 %v2112_v48 }
 0xe86   :  { %2222 = vpow2.f32 %v1954_v49  ;;  %v1955_v60 = vmul.f32 -1.442695, %v1375_v44  ;;  %v1625_v47 = vpop.f32.mrf.mxu0  ;;  %v2132_v50 = vld [vmem:[#allocation17 + $0x50] sm:$0xff]  }
 0xe87   :  { %2224 = vtanh.f32 %v1375_v44  ;;  %1495 = vmatpush1.bf16.msra.mxu1 %v2110_v61  ;;  %v2133_v44 = vld [vmem:[#allocation17 + $0x10] sm:$0xff]  }
 0xe88   :  { %1496 = vmatprep.subr.bf16.mxu1 %v2118_v11  ;;  %v1627_v49 = vpop.f32.mrf.mxu0 }
 0xe8a   :  { %v1628_v27 = vpop.f32.mrf.mxu0 }
 0xe8b   :  { %1497 = vmatpush1.bf16.msra.mxu1 %v2116_v13 }
 0xe8c   :  { %1498 = vmatprep.subr.bf16.mxu1 %v2121_v28 }
 0xe8f   :  { %1499 = vmatpush1.bf16.msra.mxu1 %v2119_v17 }
 0xe90   :  { %2001 = vmatprep.subr.bf16.mxu1 %v2122_v31 }
 0xe93   :  { %v2223_v45 = vpop.eup %2222 }
 0xe94   :  { %v1382_v51 = vadd.f32 1.0, %v2223_v45  ;;  %v2225_v2 = vpop.eup %2224  ;;  %v2134_v45 = vld [vmem:[#allocation17 + $0x48] sm:$0xff]  }
 0xe96   :  { %2226 = vrcp.f32 %v1382_v51  ;;  %v2135_v51 = vld [vmem:[#allocation17 + $0x8] sm:$0xff]  }
 0xe97   :  { %2228 = vpow2.f32 %v1955_v60 }
 0xea3   :  { %v2227_v52 = vpop.eup %2226 }
 0xea4   :  { %v1394_v53 = vmul.f32 %v2227_v52, %v2225_v2  ;;  %v2229_v4 = vpop.eup %2228  ;;  %v1393_v62 = vmul.f32 %v2227_v52, %v1391_v6  ;;  %v2136_v2 = vld [vmem:[#allocation17 + $0x40] sm:$0xff]   ;;  %v1832_v6 = vld [vmem:[#allocation2] sm:$0x1] }
 0xea5   :  { %v1383_v22 = vadd.f32 1.0, %v2229_v4  ;;  %v2137_v52 = vld [vmem:[#allocation17] sm:$0xff]  }
 0xea6   :  { %1396 = vrot.lane.b32.xlu1 %v1394_v53, %s2460_s25  ;;  %v1630_v53 = vld [vmem:[%s3016_s10] sm:$0x3] }
 0xea7   :  { %2230 = vrcp.f32 %v1383_v22  ;;  %v1635_v54 = vrot.slane %v1630_v53, %v2687_v36  ;;  %v1639_v38 = vrot.slane %v1630_v53, %v440_v46  ;;  %v1979_v46 = vld [vmem:[%s3018_s12] ss:$0 sm:$0xff]  ;;  %s1890_s12 = sshll.u32 %s2471_s18, 4  ;;  %s1891_s12 = int_to_ptr.vmem [resolvable:$true] %s1890_s12 }
 0xea8   :  { %s2421_s19 = scalar_lea.vmem %s1891_s12, 16  ;;  %s2425_s3 = scalar_lea.vmem %s1891_s12, 32 }
 0xea9   :  { %p2422_p3 = scmp.ne.s32.totalorder %s1891_s12, %s2421_s19  ;;  %p2426_p4 = scmp.lt.s32.totalorder %s1891_s12, %s1891_s12 }
 0xeaa   :  { %1835 = vperm.xlu1 %2062, %v1832_v6   ;;  %p2427_p5 = scmp.lt.s32.totalorder %s2425_s3, %s2421_s19 }
 0xeac   :  { %p2428_p6 = por %p2427_p5, %p2426_p4 }
 0xeae   :  { %p2429_p7 = pnand %p2428_p6, %p2422_p3 }
 0xeb4   :  { %v2231_v5 = vpop.eup %2230 }
 0xf18   :  { %v1397_v7 = vpop.permute.xlu1 %1396 }
 0xf19   :  { %v1399_v8 = vadd.f32 %v1397_v7, %v1393_v62 }
 0xf1b   :  { %2232 = vtanh.f32 %v1399_v8 }
 0xf25   :  { %v1836_v28 = vpop.permute.xlu1 %1835 }
 0xf26   :  { %v1841_v17 = vrot.slane %v1836_v28, %v2687_v36 }
 0xf28   :  { %v2233_v26 = vpop.eup %2232 }
 0xf29   :  { %v1401_v30 = vmul.f32 %v2233_v26, %v2231_v5 }
 0xf2b   :  { %1404 = vrot.lane.b32.xlu0 %v1401_v30, %s2460_s25 }
 0xf9d   :  { %v1405_v32 = vpop.permute.xlu0 %1404 }
 0xf9e   :  { %v1407_v34 = vmul.f32 %v1405_v32, %v2769_v63  ;;  %v2125_v63 = vld [vmem:[#allocation17 + $0x30] sm:$0xff]  }
 0xfa0   :  { %v1408_v37 = vsel %vm1402_vm10, %v1407_v34, -inf }
 0xfa1   :  { %v1409_v1 = vmax.f32 %v2969_v16, %v1408_v37  ;;  %v2128_v16 = vld [vmem:[#allocation17 + $0x60] sm:$0xff]  }
 0xfa3   :  { %v1416_v39 = vmax.f32 %v1409_v1, 0.0 }
 0xfa5   :  { %v1417_v40 = vsel %vm1415_vm11, %v1416_v39, %v1409_v1 }
 0xfa6   :  { %v1418_v41 = vsel %vm468_vm2, %v1417_v40, 0.0 }
 0xfa7   :  { %v1432_v20 = vpack.c.bf16 %v1418_v41, %v1418_v41 }
 0xfa9   :  { %1965 = vmatmul.mubr.msk.bf16.vlgmr.msra.gmra.mxu1 %vm220_vm1, %v1432_v20 }
 0xfaa   :  { %2002 = vmatpush3.bf16.msra.mxu1 %v2123_v19 }
 0xfab   :  { %2003 = vmatprep.subr.bf16.mxu1 %v2124_v21 }
 0xfae   :  { %2004 = vmatpush3.bf16.msra.mxu1 %v2125_v63 }
 0xfaf   :  { %2005 = vmatprep.subr.bf16.mxu1 %v2126_v42 }
 0xfb2   :  { %2006 = vmatpush3.bf16.msra.mxu1 %v2127_v23 }
 0xfb3   :  { %2007 = vmatprep.subr.bf16.mxu1 %v2128_v16 }
 0xfb6   :  { %2008 = vmatpush3.bf16.msra.mxu1 %v2129_v25 }
 0xfb7   :  { %2009 = vmatprep.subr.bf16.mxu1 %v2130_v24 }
 0xfba   :  { %2010 = vmatpush3.bf16.msra.mxu1 %v2131_v3 }
 0xfbb   :  { %2011 = vmatprep.subr.bf16.mxu1 %v2132_v50 }
 0xfbe   :  { %2012 = vmatpush3.bf16.msra.mxu1 %v2133_v44 }
 0xfbf   :  { %2013 = vmatprep.subr.bf16.mxu1 %v2134_v45 }
 0xfc2   :  { %2014 = vmatpush3.bf16.msra.mxu1 %v2135_v51 }
 0xfc3   :  { %2015 = vmatprep.subr.bf16.mxu1 %v2136_v2 }
 0xfc6   :  { %2016 = vmatpush3.bf16.msra.mxu1 %v2137_v52 }
0x1069   :  { %v1518_v55 = vpop.f32.mrf.mxu1 }
0x106a   :  { %v1624_v56 = vadd.f32 %v1623_v43, %v1518_v55 }
0x106b   :  { %v1520_v57 = vpop.f32.mrf.mxu1 }
0x106c   :  { %v1642_v58 = vadd.f32 %v1635_v54, %v1624_v56  ;;  %v1626_v59 = vadd.f32 %v1625_v47, %v1520_v57 }
0x106d   :  { %v1522_v48 = vpop.f32.mrf.mxu1 }
0x106e   :  { %vm1644_vm12 = vcmp.gt.f32.partialorder %v1642_v58, 0.0  ;;  %v1646_v61 = vmul.f32 0.01, %v1642_v58  ;;  %v1643_v18 = vadd.f32 %v1639_v38, %v1626_v59 }
0x106f   :  { %v1523_v12 = vpop.f32.mrf.mxu1 }
0x1070   :  { %v1647_v15 = vmul.f32 0.01, %v1643_v18  ;;  %vm1645_vm13 = vcmp.gt.f32.partialorder %v1643_v18, 0.0  ;;  %v1648_v0 = vsel %vm1644_vm12, %v1642_v58, %v1646_v61 }
0x1071   :  { %v1650_v4 = vpack.c.bf16 %v1648_v0, %v1648_v0 }
0x1072   :  { %v1649_v29 = vsel %vm1645_vm13, %v1643_v18, %v1647_v15 }
0x1073   :  { %v1651_v60 = vpack.c.bf16 %v1649_v29, %v1649_v29 }
0x1075   :  { %1819 = vmatprep.mubr.bf16.mxu1 %v1651_v60 }
0x1076   :  { %1820 = vmatmul.mubr.bf16.vlgmr.msra.gmra.mxu1 %v1650_v4 }
0x1136   :  { %v2017_v33 = vpop.f32.mrf.mxu1 }
0x1138   :  { %v2018_v22 = vpop.f32.mrf.mxu1 }
0x1139   :  { %v2019_v62 = vadd.f32 %v2018_v22, %v2017_v33 }
0x113a   :  { %v2020_v7 = vpop.f32.mrf.mxu1 }
0x113b   :  { %v1822_v8 = vadd.f32 %v2019_v62, %v1979_v46 }
0x113c   :  { %v2021_v9 = vpop.f32.mrf.mxu1 }
0x113d   :  { %vm1827_vm14 = vcmp.gt.f32.partialorder %v1822_v8, 0.0  ;;  %v1828_v10 = vmul.f32 0.01, %v1822_v8 }
0x113f   :  { %v1829_v11 = vsel %vm1827_vm14, %v1822_v8, %v1828_v10 }
0x1140   :  { %v1831_v13 = vpack.c.bf16 %v1829_v11, %v1829_v11 }
0x1142   :  { %2038 = vmatpush3.bf16.xpose.msra.mxu0 %v1831_v13 }
0x1149   :  { %2040 = vmatmul.mubr.bf16.vlgmr.msra.gmra.mxu0 %v1830_v14 }
0x1209   :  { %v1876_v5 = vpop.f32.mrf.mxu0 }
0x120a   :  { %v1877_v26 = vadd.f32 %v1876_v5, %v1841_v17 }
0x120b   :  { %v2041_v30 = vpop.f32.mrf.mxu0 }
0x120c   :  { %1883 = vst.msk [vmem:[#allocation18] sm:$0x1] %vm1882_vm15, %v1877_v26 }
0x120d   :  { %v1879_v31 = vpop.f32.mrf.mxu0 }
0x120e   :  { %2432 = shalt.err (!%p2429_p7)
}
0x120f   :  { %1893 = dma.vmem_to_hbm [thread:$0]  %s1891_s12, 16, %s3021_s15, [#allocation5]   ;;  %v2042_v36 = vpop.f32.mrf.mxu0 }
0x1210   :  { %2451 = dma.done.wait [#allocation5], 16  }
0x1211   :  { %2452 = vsyncadd [#allocation5], 4294967280 }
0x1212   :  { %1897 = vsyncpa [#allocation4], 1 }
0x1213   :  { %1898 = vsyncpa [#allocation7], 1 }
0x1214   :  { %1899 = vsyncpa [#allocation10], 1 }
0x1215   :  { %1900 = vsyncpa [#allocation13], 1 }
0x1216   :  { %1901 = vsyncpa [#allocation16], 1 }
0x1217   :  { %1902 = vsyncpa [#allocation5], 1 }

</bundles_post_ra>
